<compile_context>
chip_gen: v7x
topology: tpu7x:2x2x1
jax: 0.10.0
libtpu: 0.0.40
codegen_flags: <defaults>
</compile_context>

<pallas_src>
import functools
import math

import jax
import jax.numpy as jnp
from jax.experimental import pallas as pl
from jax.experimental.pallas import tpu as pltpu


def _round_up(x, m):
    return ((x + m - 1) // m) * m


def _pick_tile(R, tile_rows):
    """Row-tile choice: big enough to fill the MXU M-axis and amortize the
    per-grid-step pipeline overhead, small enough that the grid has >=2 steps
    whenever R allows it (so ("parallel",) shards across both v7x TensorCores).
    Tiny inputs get a single full-extent block (no masking needed)."""
    if R <= 16:
        return R
    target = _round_up(min(tile_rows, R), 8)
    half = _round_up(pl.cdiv(R, 2), 256 if R > 512 else 8)
    return min(target, half)


def _decoder_kernel(w_ref, e_ref, wstk_ref, w1e_ref, bstk_ref, o_ref):
    """One row-tile of the fused 4-layer MLP + residual.

    wstk_ref : (4, H, H)  stacked [W1_w, W2, W3, W4], matmul dtype (bf16/f32)
    w1e_ref  : (De, H)    exp-block of W1, matmul dtype
    bstk_ref : (4, 1, H)  stacked biases, f32
    """
    cdt = wstk_ref.dtype

    # fc1 on concat(w, exp), expressed as a split matmul; accumulate in f32.
    h = (jnp.dot(w_ref[...].astype(cdt), wstk_ref[0],
                 preferred_element_type=jnp.float32)
         + jnp.dot(e_ref[...].astype(cdt), w1e_ref[...],
                   preferred_element_type=jnp.float32)
         + bstk_ref[0])
    h = jnp.maximum(h, 0.0)

    h = jnp.dot(h.astype(cdt), wstk_ref[1],
                preferred_element_type=jnp.float32) + bstk_ref[1]
    h = jnp.maximum(h, 0.0)

    h = jnp.dot(h.astype(cdt), wstk_ref[2],
                preferred_element_type=jnp.float32) + bstk_ref[2]
    h = jnp.maximum(h, 0.0)

    out = jnp.dot(h.astype(cdt), wstk_ref[3],
                  preferred_element_type=jnp.float32) + bstk_ref[3]

    # Residual: re-read w from the resident VMEM block (not held live above).
    o_ref[...] = (w_ref[...].astype(jnp.float32) + out).astype(o_ref.dtype)


@functools.partial(jax.jit, static_argnames=("tile_rows", "matmul_dtype"))
def transfer_decoder_pallas(w, exp, params, *, tile_rows=1024,
                            matmul_dtype=jnp.bfloat16):
    """w: (..., 512) f32, exp: (..., 64) f32 -> w + MLP(concat(w, exp)).

    matmul_dtype controls the MXU operand dtype (weights AND the inter-layer
    activations get cast to it); accumulation / bias / ReLU / residual stay
    f32.  bf16 default is a documented precision trade-off (~1e-2 relative).
    """
    lead = w.shape[:-1]
    Dw = w.shape[-1]
    De = exp.shape[-1]
    H = params["w2"].shape[0]
    Do = params["w4"].shape[1]
    assert Dw == Do, "residual requires output_size == w feature dim"
    assert Dw == H == Do, ("stacked-weight kernel assumes the square module "
                           "defaults (w_dim == hidden == output == 512)")

    R = int(math.prod(lead)) if lead else 1
    w2d = w.reshape(R, Dw)
    e2d = exp.reshape(R, De)

    cdt = jnp.dtype(matmul_dtype)
    # Stack the grid-invariant weights/biases: 5 tensor inputs instead of 11.
    wstk = jnp.stack([params["w1w"], params["w2"],
                      params["w3"], params["w4"]]).astype(cdt)          # (4,H,H)
    w1e = params["w1e"].astype(cdt)                                     # (De,H)
    bstk = jnp.stack([params["b1"], params["b2"],
                      params["b3"], params["b4"]]).astype(jnp.float32)  # (4,1,H)

    tile = _pick_tile(R, tile_rows)
    grid = (pl.cdiv(R, tile),)

    # Grid-invariant inputs: single-buffered (they never change across steps).
    def const(shape):
        return pl.BlockSpec(shape, lambda i: (0,) * len(shape),
                            pipeline_mode=pl.Buffered(1))

    flops = 2 * R * (Dw * H + De * H + 2 * H * H + H * Do)
    bytes_accessed = ((R * Dw + R * De + R * Do) * 4
                      + (wstk.size + w1e.size) * cdt.itemsize
                      + bstk.size * 4)

    # TODO(synk): if exp/w codes are repeated across many rows (one code per
    # frame broadcast over samples), dedup and precompute e @ W1_exp once per
    # unique code in the wrapper to skip the K=64 partial-depth MXU pass.
    out2d = pl.pallas_call(
        _decoder_kernel,
        out_shape=jax.ShapeDtypeStruct((R, Do), w.dtype),
        grid_spec=pltpu.PrefetchScalarGridSpec(
            num_scalar_prefetch=0,
            grid=grid,
            in_specs=[
                pl.BlockSpec((tile, Dw), lambda i: (i, 0)),   # w rows
                pl.BlockSpec((tile, De), lambda i: (i, 0)),   # exp rows
                const((4, H, H)),                             # stacked weights
                const((De, H)),                               # W1 exp-block
                const((4, 1, H)),                             # stacked biases
            ],
            out_specs=pl.BlockSpec((tile, Do), lambda i: (i, 0)),
        ),
        compiler_params=pltpu.CompilerParams(
            dimension_semantics=("parallel",),
            vmem_limit_bytes=48 * 1024 * 1024),
        cost_estimate=pl.CostEstimate(
            flops=flops, transcendentals=0, bytes_accessed=bytes_accessed),
    )(w2d, e2d, wstk, w1e, bstk)

    return out2d.reshape(*lead, Do)


def init_params(key, input_w=512, input_exp=64, hidden=512, output=512,
                dtype=jnp.float32):
    """Mirror the PyTorch init: xavier_uniform_ weights, default nn.Linear bias
    (uniform +-1/sqrt(fan_in)).  Weights stored as (in, out); fc1 pre-split
    into its w-block (first input_w rows) and exp-block (last input_exp rows)."""

    def xavier(k, fin, fout):
        a = math.sqrt(6.0 / (fin + fout))
        return jax.random.uniform(k, (fin, fout), dtype, minval=-a, maxval=a)

    def bias(k, fin, fout):
        b = 1.0 / math.sqrt(fin)
        return jax.random.uniform(k, (1, fout), dtype, minval=-b, maxval=b)

    ks = jax.random.split(key, 8)
    in1 = input_w + input_exp
    w1 = xavier(ks[0], in1, hidden)
    return {
        "w1w": w1[:input_w], "w1e": w1[input_w:], "b1": bias(ks[1], in1, hidden),
        "w2": xavier(ks[2], hidden, hidden), "b2": bias(ks[3], hidden, hidden),
        "w3": xavier(ks[4], hidden, hidden), "b3": bias(ks[5], hidden, hidden),
        "w4": xavier(ks[6], hidden, output), "b4": bias(ks[7], hidden, output),
    }


def reference_forward(w, exp, params):
    """Pure-JAX f32 reference of the PyTorch forward."""
    x = jnp.concatenate([w, exp], axis=-1)
    w1 = jnp.concatenate([params["w1w"], params["w1e"]], axis=0).astype(jnp.float32)
    h = jnp.maximum(x @ w1 + params["b1"], 0.0)
    h = jnp.maximum(h @ params["w2"].astype(jnp.float32) + params["b2"], 0.0)
    h = jnp.maximum(h @ params["w3"].astype(jnp.float32) + params["b3"], 0.0)
    out = h @ params["w4"].astype(jnp.float32) + params["b4"]
    return w + out


if __name__ == "__main__":
    key = jax.random.PRNGKey(0)
    kw, ke, kp = jax.random.split(key, 3)

    # Module-implied sizes: w is the 512-d style code, exp the 64-d expression code.
    B = 4
    W_DIM, EXP_DIM, HIDDEN, OUT_DIM = 512, 64, 512, 512

    w = jax.random.normal(kw, (B, W_DIM), dtype=jnp.float32)
    exp = jax.random.normal(ke, (B, EXP_DIM), dtype=jnp.float32)
    params = init_params(kp, W_DIM, EXP_DIM, HIDDEN, OUT_DIM)

    ref = reference_forward(w, exp, params)

    # Default fast path: bf16 MXU operands, f32 accumulation/bias/ReLU/residual.
    out_bf16 = jax.block_until_ready(transfer_decoder_pallas(w, exp, params))
    assert out_bf16.shape == (B, OUT_DIM)
    assert jnp.allclose(out_bf16, ref, atol=1e-1, rtol=1e-1), "bf16 kernel mismatch"

    # Exact f32 operand path.
    out_f32 = jax.block_until_ready(
        transfer_decoder_pallas(w, exp, params, matmul_dtype=jnp.float32))
    assert out_f32.shape == (B, OUT_DIM)
    assert jnp.allclose(out_f32, ref, atol=1e-3, rtol=1e-3), "f32 kernel mismatch"

    # Non-divisible row count + extra leading dims: exercises the cdiv-grid /
    # masked-partial-block path (no wrapper-side pad or slice anymore).
    w3 = jax.random.normal(kw, (2, 9, W_DIM), dtype=jnp.float32)
    e3 = jax.random.normal(ke, (2, 9, EXP_DIM), dtype=jnp.float32)
    ref3 = reference_forward(w3, e3, params)
    out3 = jax.block_until_ready(
        transfer_decoder_pallas(w3, e3, params, matmul_dtype=jnp.float32))
    assert out3.shape == (2, 9, OUT_DIM)
    assert jnp.allclose(out3, ref3, atol=1e-3, rtol=1e-3), "ragged-grid mismatch"

    print("KERNEL_OK")
</pallas_src>

<mosaic_0001>
module attributes {stable_mosaic.version = 11 : i64} {
  func.func @_decoder_kernel(%arg0: i32, %arg1: memref<4x512xf32, #tpu.memory_space<vmem>>, %arg2: memref<4x64xf32, #tpu.memory_space<vmem>>, %arg3: memref<4x512x512xbf16, #tpu.memory_space<vmem>>, %arg4: memref<64x512xbf16, #tpu.memory_space<vmem>>, %arg5: memref<4x1x512xf32, #tpu.memory_space<vmem>>, %arg6: memref<4x512xf32, #tpu.memory_space<vmem>>) attributes {dimension_semantics = [#tpu.dimension_semantics<parallel>], iteration_bounds = array<i64: 1>, scalar_prefetch = 0 : i64, scratch_operands = 0 : i64, tpu.core_type = #tpu.core_type<tc>, window_params = [{transform_indices = @transform_0, window_bounds = array<i64: 4, 512>}, {transform_indices = @transform_1, window_bounds = array<i64: 4, 64>}, {pipeline_mode = #tpu.pipeline_mode<synchronous>, transform_indices = @transform_2, window_bounds = array<i64: 4, 512, 512>}, {pipeline_mode = #tpu.pipeline_mode<synchronous>, transform_indices = @transform_3, window_bounds = array<i64: 64, 512>}, {pipeline_mode = #tpu.pipeline_mode<synchronous>, transform_indices = @transform_4, window_bounds = array<i64: 4, 1, 512>}, {transform_indices = @transform_5, window_bounds = array<i64: 4, 512>}]} {
    %c0 = arith.constant 0 : index
    %c0_0 = arith.constant 0 : index
    %0 = vector.load %arg1[%c0, %c0_0] : memref<4x512xf32, #tpu.memory_space<vmem>>, vector<4x512xf32>
    %1 = arith.truncf %0 : vector<4x512xf32> to vector<4x512xbf16>
    %c0_1 = arith.constant 0 : index
    %c0_2 = arith.constant 0 : index
    %c0_3 = arith.constant 0 : index
    %2 = vector.load %arg3[%c0_1, %c0_2, %c0_3] : memref<4x512x512xbf16, #tpu.memory_space<vmem>>, vector<1x512x512xbf16>
    %3 = vector.shape_cast %2 : vector<1x512x512xbf16> to vector<512x512xbf16>
    %cst = arith.constant dense<0.000000e+00> : vector<4x512xf32>
    %4 = tpu.matmul %1, %3, %cst {dimension_numbers = #tpu.dot_dimension_numbers<[1], [0], [0], [1], [0, 0, 1, 1], [], []>} : vector<4x512xbf16>, vector<512x512xbf16>, vector<4x512xf32> -> vector<4x512xf32>
    %c0_4 = arith.constant 0 : index
    %c0_5 = arith.constant 0 : index
    %5 = vector.load %arg2[%c0_4, %c0_5] : memref<4x64xf32, #tpu.memory_space<vmem>>, vector<4x64xf32>
    %6 = arith.truncf %5 : vector<4x64xf32> to vector<4x64xbf16>
    %c0_6 = arith.constant 0 : index
    %c0_7 = arith.constant 0 : index
    %7 = vector.load %arg4[%c0_6, %c0_7] : memref<64x512xbf16, #tpu.memory_space<vmem>>, vector<64x512xbf16>
    %cst_8 = arith.constant dense<0.000000e+00> : vector<4x512xf32>
    %8 = tpu.matmul %6, %7, %cst_8 {dimension_numbers = #tpu.dot_dimension_numbers<[1], [0], [0], [1], [0, 0, 1, 1], [], []>} : vector<4x64xbf16>, vector<64x512xbf16>, vector<4x512xf32> -> vector<4x512xf32>
    %9 = arith.addf %4, %8 : vector<4x512xf32>
    %c0_9 = arith.constant 0 : index
    %c0_10 = arith.constant 0 : index
    %c0_11 = arith.constant 0 : index
    %10 = vector.load %arg5[%c0_9, %c0_10, %c0_11] : memref<4x1x512xf32, #tpu.memory_space<vmem>>, vector<1x1x512xf32>
    %11 = vector.shape_cast %10 : vector<1x1x512xf32> to vector<1x512xf32>
    %12 = vector.broadcast %11 : vector<1x512xf32> to vector<4x512xf32>
    %13 = arith.addf %9, %12 : vector<4x512xf32>
    %cst_12 = arith.constant 0.000000e+00 : f32
    %14 = vector.broadcast %cst_12 : f32 to vector<4x512xf32>
    %15 = arith.maximumf %13, %14 : vector<4x512xf32>
    %16 = arith.truncf %15 : vector<4x512xf32> to vector<4x512xbf16>
    %c1 = arith.constant 1 : index
    %c0_13 = arith.constant 0 : index
    %c0_14 = arith.constant 0 : index
    %17 = vector.load %arg3[%c1, %c0_13, %c0_14] : memref<4x512x512xbf16, #tpu.memory_space<vmem>>, vector<1x512x512xbf16>
    %18 = vector.shape_cast %17 : vector<1x512x512xbf16> to vector<512x512xbf16>
    %cst_15 = arith.constant dense<0.000000e+00> : vector<4x512xf32>
    %19 = tpu.matmul %16, %18, %cst_15 {dimension_numbers = #tpu.dot_dimension_numbers<[1], [0], [0], [1], [0, 0, 1, 1], [], []>} : vector<4x512xbf16>, vector<512x512xbf16>, vector<4x512xf32> -> vector<4x512xf32>
    %c1_16 = arith.constant 1 : index
    %c0_17 = arith.constant 0 : index
    %c0_18 = arith.constant 0 : index
    %20 = vector.load %arg5[%c1_16, %c0_17, %c0_18] : memref<4x1x512xf32, #tpu.memory_space<vmem>>, vector<1x1x512xf32>
    %21 = vector.shape_cast %20 : vector<1x1x512xf32> to vector<1x512xf32>
    %22 = vector.broadcast %21 : vector<1x512xf32> to vector<4x512xf32>
    %23 = arith.addf %19, %22 : vector<4x512xf32>
    %cst_19 = arith.constant 0.000000e+00 : f32
    %24 = vector.broadcast %cst_19 : f32 to vector<4x512xf32>
    %25 = arith.maximumf %23, %24 : vector<4x512xf32>
    %26 = arith.truncf %25 : vector<4x512xf32> to vector<4x512xbf16>
    %c2 = arith.constant 2 : index
    %c0_20 = arith.constant 0 : index
    %c0_21 = arith.constant 0 : index
    %27 = vector.load %arg3[%c2, %c0_20, %c0_21] : memref<4x512x512xbf16, #tpu.memory_space<vmem>>, vector<1x512x512xbf16>
    %28 = vector.shape_cast %27 : vector<1x512x512xbf16> to vector<512x512xbf16>
    %cst_22 = arith.constant dense<0.000000e+00> : vector<4x512xf32>
    %29 = tpu.matmul %26, %28, %cst_22 {dimension_numbers = #tpu.dot_dimension_numbers<[1], [0], [0], [1], [0, 0, 1, 1], [], []>} : vector<4x512xbf16>, vector<512x512xbf16>, vector<4x512xf32> -> vector<4x512xf32>
    %c2_23 = arith.constant 2 : index
    %c0_24 = arith.constant 0 : index
    %c0_25 = arith.constant 0 : index
    %30 = vector.load %arg5[%c2_23, %c0_24, %c0_25] : memref<4x1x512xf32, #tpu.memory_space<vmem>>, vector<1x1x512xf32>
    %31 = vector.shape_cast %30 : vector<1x1x512xf32> to vector<1x512xf32>
    %32 = vector.broadcast %31 : vector<1x512xf32> to vector<4x512xf32>
    %33 = arith.addf %29, %32 : vector<4x512xf32>
    %cst_26 = arith.constant 0.000000e+00 : f32
    %34 = vector.broadcast %cst_26 : f32 to vector<4x512xf32>
    %35 = arith.maximumf %33, %34 : vector<4x512xf32>
    %36 = arith.truncf %35 : vector<4x512xf32> to vector<4x512xbf16>
    %c3 = arith.constant 3 : index
    %c0_27 = arith.constant 0 : index
    %c0_28 = arith.constant 0 : index
    %37 = vector.load %arg3[%c3, %c0_27, %c0_28] : memref<4x512x512xbf16, #tpu.memory_space<vmem>>, vector<1x512x512xbf16>
    %38 = vector.shape_cast %37 : vector<1x512x512xbf16> to vector<512x512xbf16>
    %cst_29 = arith.constant dense<0.000000e+00> : vector<4x512xf32>
    %39 = tpu.matmul %36, %38, %cst_29 {dimension_numbers = #tpu.dot_dimension_numbers<[1], [0], [0], [1], [0, 0, 1, 1], [], []>} : vector<4x512xbf16>, vector<512x512xbf16>, vector<4x512xf32> -> vector<4x512xf32>
    %c3_30 = arith.constant 3 : index
    %c0_31 = arith.constant 0 : index
    %c0_32 = arith.constant 0 : index
    %40 = vector.load %arg5[%c3_30, %c0_31, %c0_32] : memref<4x1x512xf32, #tpu.memory_space<vmem>>, vector<1x1x512xf32>
    %41 = vector.shape_cast %40 : vector<1x1x512xf32> to vector<1x512xf32>
    %42 = vector.broadcast %41 : vector<1x512xf32> to vector<4x512xf32>
    %43 = arith.addf %39, %42 : vector<4x512xf32>
    %c0_33 = arith.constant 0 : index
    %c0_34 = arith.constant 0 : index
    %44 = vector.load %arg1[%c0_33, %c0_34] : memref<4x512xf32, #tpu.memory_space<vmem>>, vector<4x512xf32>
    %45 = arith.addf %44, %43 : vector<4x512xf32>
    %c0_35 = arith.constant 0 : index
    %c0_36 = arith.constant 0 : index
    %46 = vector.load %arg6[%c0_35, %c0_36] : memref<4x512xf32, #tpu.memory_space<vmem>>, vector<4x512xf32>
    tpu.vector_store %arg6[%c0_35, %c0_36], %45 {strides = array<i32>} : memref<4x512xf32, #tpu.memory_space<vmem>>, vector<4x512xf32>,
    return
  }
  func.func @transform_0(%arg0: i32) -> (i32, i32) {
    %c0_i32 = arith.constant 0 : i32
    %c0_i32_0 = arith.constant 0 : i32
    return %arg0, %c0_i32 : i32, i32
  }
  func.func @transform_1(%arg0: i32) -> (i32, i32) {
    %c0_i32 = arith.constant 0 : i32
    %c0_i32_0 = arith.constant 0 : i32
    return %arg0, %c0_i32 : i32, i32
  }
  func.func @transform_2(%arg0: i32) -> (i32, i32, i32) {
    %c0_i32 = arith.constant 0 : i32
    %c0_i32_0 = arith.constant 0 : i32
    %c0_i32_1 = arith.constant 0 : i32
    %c0_i32_2 = arith.constant 0 : i32
    return %c0_i32, %c0_i32_0, %c0_i32_1 : i32, i32, i32
  }
  func.func @transform_3(%arg0: i32) -> (i32, i32) {
    %c0_i32 = arith.constant 0 : i32
    %c0_i32_0 = arith.constant 0 : i32
    %c0_i32_1 = arith.constant 0 : i32
    return %c0_i32, %c0_i32_0 : i32, i32
  }
  func.func @transform_4(%arg0: i32) -> (i32, i32, i32) {
    %c0_i32 = arith.constant 0 : i32
    %c0_i32_0 = arith.constant 0 : i32
    %c0_i32_1 = arith.constant 0 : i32
    %c0_i32_2 = arith.constant 0 : i32
    return %c0_i32, %c0_i32_0, %c0_i32_1 : i32, i32, i32
  }
  func.func @transform_5(%arg0: i32) -> (i32, i32) {
    %c0_i32 = arith.constant 0 : i32
    %c0_i32_0 = arith.constant 0 : i32
    return %arg0, %c0_i32 : i32, i32
  }
}

</mosaic_0001>

<bundles_post_ra>
// kernel: transfer_decoder_pallas.1
= control target key start
LH: loop header
LB: loop body
LE: loop exit
PB: predicated region body
PF: predicated region fallthrough
CT: control target
= control target key end

     0   :  { %v5869_v2 = vmov 0   ;;  %vm260_vm0 = vcmask 523264   ;;  %s7600_s0 = inlined_call_operand.vmem [shape: f32[4,512], index: 0, kind: input, shape index: {}]   ;;  %s7601_s1 = inlined_call_operand.vmem [shape: f32[4,64], index: 1, kind: input, shape index: {}]   ;;  %s7602_s2 = inlined_call_operand.vmem [shape: bf16[4,512,512], index: 2, kind: input, shape index: {}]   ;;  %s7603_s3 = inlined_call_operand.vmem [shape: bf16[64,512], index: 3, kind: input, shape index: {}]   ;;  %s7604_s4 = inlined_call_operand.vmem [shape: f32[4,1,512], index: 4, kind: input, shape index: {}]   ;;  %s7605_s5 = inlined_call_operand.hbm [shape: f32[4,512], index: 5, kind: output, shape index: {}]  }
   0x1   :  { %v5049_v0 = vld [vmem:[%s7603_s3 + $0x4] ss:$16 sps:$4 sm:$0xff]   ;;  %v5051_v1 = vld [vmem:[%s7603_s3 + $0xc] ss:$16 sps:$4 sm:$0xff]   ;;  %296 = vmatprep.mubr.bf16.mxu0 %v5869_v2  ;;  %337 = vmatprep.mubr.bf16.mxu1 %v5869_v2  ;;  %v5053_v3 = vld [vmem:[%s7603_s3] ss:$16 sps:$4 sm:$0xff]  }
   0x2   :  { %264 = vmatprep.subr.bf16.mxu0 %v5049_v0  ;;  %v5054_v4 = vld [vmem:[%s7603_s3 + $0x8] ss:$16 sps:$4 sm:$0xff]   ;;  %305 = vmatprep.subr.bf16.mxu1 %v5051_v1  ;;  %v5055_v5 = vld [vmem:[%s7603_s3 + $0x24] ss:$16 sps:$4 sm:$0xff]   ;;  %v5057_v6 = vld [vmem:[%s7603_s3 + $0x2c] ss:$16 sps:$4 sm:$0xff]  }
   0x3   :  { %265 = vmatpush1.bf16.msra.mxu0 %v5053_v3  ;;  %306 = vmatpush1.bf16.msra.mxu1 %v5054_v4  ;;  %v5059_v7 = vld [vmem:[%s7603_s3 + $0x20] ss:$16 sps:$4 sm:$0xff]   ;;  %v5060_v8 = vld [vmem:[%s7603_s3 + $0x28] ss:$16 sps:$4 sm:$0xff]   ;;  %v5061_v9 = vld [vmem:[%s7603_s3 + $0x44] ss:$16 sps:$4 sm:$0xff]  }
   0x4   :  { %266 = vmatprep.subr.bf16.mxu0 %v5055_v5  ;;  %307 = vmatprep.subr.bf16.mxu1 %v5057_v6  ;;  %v5063_v10 = vld [vmem:[%s7603_s3 + $0x4c] ss:$16 sps:$4 sm:$0xff]   ;;  %v5065_v11 = vld [vmem:[%s7603_s3 + $0x40] ss:$16 sps:$4 sm:$0xff]   ;;  %v5066_v12 = vld [vmem:[%s7603_s3 + $0x48] ss:$16 sps:$4 sm:$0xff]  }
   0x5   :  { %v5067_v13 = vld [vmem:[%s7603_s3 + $0x64] ss:$16 sps:$4 sm:$0xff]   ;;  %v5069_v14 = vld [vmem:[%s7603_s3 + $0x6c] ss:$16 sps:$4 sm:$0xff]   ;;  %v5071_v15 = vld [vmem:[%s7603_s3 + $0x60] ss:$16 sps:$4 sm:$0xff]  }
   0x6   :  { %v5072_v16 = vld [vmem:[%s7603_s3 + $0x68] ss:$16 sps:$4 sm:$0xff]   ;;  %v162_v17 = vld [vmem:[%s7601_s1] sm:$0xf]  ;;  %v5075_v18 = vld [vmem:[%s7602_s2 + $0x4] ss:$16 sps:$4 sm:$0xff]  }
   0x7   :  { %267 = vmatpush1.bf16.msra.mxu0 %v5059_v7  ;;  %308 = vmatpush1.bf16.msra.mxu1 %v5060_v8  ;;  %v5078_v19 = vld [vmem:[%s7602_s2 + $0x204] ss:$16 sps:$4 sm:$0xff]   ;;  %v163_v20 = vpack.c.bf16 %v162_v17, %v162_v17  ;;  %v5073_v21 = vld [vmem:[%s7602_s2] ss:$16 sps:$4 sm:$0xff]   ;;  %v23_v63 = vld [vmem:[%s7600_s0 + $0x8] sm:$0xff] }
   0x8   :  { %268 = vmatprep.subr.bf16.mxu0 %v5061_v9  ;;  %309 = vmatprep.subr.bf16.mxu1 %v5063_v10  ;;  %v5076_v22 = vld [vmem:[%s7602_s2 + $0x200] ss:$16 sps:$4 sm:$0xff]   ;;  %v5081_v23 = vld [vmem:[%s7602_s2 + $0x24] ss:$16 sps:$4 sm:$0xff]   ;;  %v27_v1 = vcombine.high %v23_v63, %v23_v63 }
   0x9   :  { %v5084_v24 = vld [vmem:[%s7602_s2 + $0x224] ss:$16 sps:$4 sm:$0xff]   ;;  %v5079_v25 = vld [vmem:[%s7602_s2 + $0x20] ss:$16 sps:$4 sm:$0xff]  }
   0xa   :  { %v5082_v26 = vld [vmem:[%s7602_s2 + $0x220] ss:$16 sps:$4 sm:$0xff]   ;;  %v5087_v27 = vld [vmem:[%s7602_s2 + $0x44] ss:$16 sps:$4 sm:$0xff]   ;;  %v6098_v6 = vpack.c.bf16 %v27_v1, %v27_v1  ;;  %v5225_v1 = vld [vmem:[%s7602_s2 + $0x128] ss:$16 sps:$4 sm:$0xff]  }
   0xb   :  { %269 = vmatpush1.bf16.msra.mxu0 %v5065_v11  ;;  %310 = vmatpush1.bf16.msra.mxu1 %v5066_v12  ;;  %v5090_v28 = vld [vmem:[%s7602_s2 + $0x244] ss:$16 sps:$4 sm:$0xff]   ;;  %v5085_v29 = vld [vmem:[%s7602_s2 + $0x40] ss:$16 sps:$4 sm:$0xff]  }
   0xc   :  { %270 = vmatprep.subr.bf16.mxu0 %v5067_v13  ;;  %311 = vmatprep.subr.bf16.mxu1 %v5069_v14  ;;  %v5088_v30 = vld [vmem:[%s7602_s2 + $0x240] ss:$16 sps:$4 sm:$0xff]   ;;  %v5093_v31 = vld [vmem:[%s7602_s2 + $0x64] ss:$16 sps:$4 sm:$0xff]  }
   0xd   :  { %v5096_v32 = vld [vmem:[%s7602_s2 + $0x264] ss:$16 sps:$4 sm:$0xff]   ;;  %v5091_v33 = vld [vmem:[%s7602_s2 + $0x60] ss:$16 sps:$4 sm:$0xff]  }
   0xe   :  { %v5094_v34 = vld [vmem:[%s7602_s2 + $0x260] ss:$16 sps:$4 sm:$0xff]   ;;  %v5099_v35 = vld [vmem:[%s7602_s2 + $0x84] ss:$16 sps:$4 sm:$0xff]  }
   0xf   :  { %271 = vmatpush1.bf16.msra.mxu0 %v5071_v15  ;;  %312 = vmatpush1.bf16.msra.mxu1 %v5072_v16  ;;  %v5102_v36 = vld [vmem:[%s7602_s2 + $0x284] ss:$16 sps:$4 sm:$0xff]   ;;  %v5097_v37 = vld [vmem:[%s7602_s2 + $0x80] ss:$16 sps:$4 sm:$0xff]  }
  0x10   :  { %986 = vmatprep.subr.bf16.mxu0 %v5075_v18  ;;  %1027 = vmatprep.subr.bf16.mxu1 %v5078_v19  ;;  %v5100_v38 = vld [vmem:[%s7602_s2 + $0x280] ss:$16 sps:$4 sm:$0xff]   ;;  %v5105_v39 = vld [vmem:[%s7602_s2 + $0xa4] ss:$16 sps:$4 sm:$0xff]  }
  0x11   :  { %v5108_v40 = vld [vmem:[%s7602_s2 + $0x2a4] ss:$16 sps:$4 sm:$0xff]   ;;  %v5103_v41 = vld [vmem:[%s7602_s2 + $0xa0] ss:$16 sps:$4 sm:$0xff]  }
  0x12   :  { %4110 = vmatmul.mubr.msk.bf16.vlgmr.msra.gmra.mrb[0].mxu0 %vm260_vm0, %v163_v20  ;;  %4111 = vmatmul.mubr.msk.bf16.vlgmr.msra.gmra.mrb[0].mxu1 %vm260_vm0, %v163_v20  ;;  %v5106_v42 = vld [vmem:[%s7602_s2 + $0x2a0] ss:$16 sps:$4 sm:$0xff]   ;;  %v5111_v43 = vld [vmem:[%s7602_s2 + $0xc4] ss:$16 sps:$4 sm:$0xff]  }
  0x13   :  { %987 = vmatpush1.bf16.msra.mxu0 %v5073_v21  ;;  %1028 = vmatpush1.bf16.msra.mxu1 %v5076_v22  ;;  %v5114_v44 = vld [vmem:[%s7602_s2 + $0x2c4] ss:$16 sps:$4 sm:$0xff]   ;;  %v5109_v45 = vld [vmem:[%s7602_s2 + $0xc0] ss:$16 sps:$4 sm:$0xff]  }
  0x14   :  { %988 = vmatprep.subr.bf16.mxu0 %v5081_v23  ;;  %1029 = vmatprep.subr.bf16.mxu1 %v5084_v24  ;;  %v5112_v46 = vld [vmem:[%s7602_s2 + $0x2c0] ss:$16 sps:$4 sm:$0xff]   ;;  %v5117_v47 = vld [vmem:[%s7602_s2 + $0xe4] ss:$16 sps:$4 sm:$0xff]  }
  0x15   :  { %v5120_v48 = vld [vmem:[%s7602_s2 + $0x2e4] ss:$16 sps:$4 sm:$0xff]   ;;  %v5115_v49 = vld [vmem:[%s7602_s2 + $0xe0] ss:$16 sps:$4 sm:$0xff]   ;;  %1059 = vmatprep.mubr.bf16.mxu1 %v6098_v6 }
  0x16   :  { %v5118_v50 = vld [vmem:[%s7602_s2 + $0x2e0] ss:$16 sps:$4 sm:$0xff]   ;;  %v5123_v51 = vld [vmem:[%s7602_s2 + $0x104] ss:$16 sps:$4 sm:$0xff]  }
  0x17   :  { %989 = vmatpush1.bf16.msra.mxu0 %v5079_v25  ;;  %1030 = vmatpush1.bf16.msra.mxu1 %v5082_v26  ;;  %v5126_v52 = vld [vmem:[%s7602_s2 + $0x304] ss:$16 sps:$4 sm:$0xff]   ;;  %v5121_v53 = vld [vmem:[%s7602_s2 + $0x100] ss:$16 sps:$4 sm:$0xff]   ;;  %v5173_v25 = vld [vmem:[%s7602_s2 + $0xc] ss:$16 sps:$4 sm:$0xff]  }
  0x18   :  { %990 = vmatprep.subr.bf16.mxu0 %v5087_v27  ;;  %1031 = vmatprep.subr.bf16.mxu1 %v5090_v28  ;;  %v5124_v54 = vld [vmem:[%s7602_s2 + $0x300] ss:$16 sps:$4 sm:$0xff]   ;;  %v5129_v55 = vld [vmem:[%s7602_s2 + $0x124] ss:$16 sps:$4 sm:$0xff]   ;;  %v5176_v26 = vld [vmem:[%s7602_s2 + $0x20c] ss:$16 sps:$4 sm:$0xff]   ;;  %v6164_v28 = vpack.c.bf16 %v23_v63, %v23_v63 }
  0x19   :  { %v5132_v56 = vld [vmem:[%s7602_s2 + $0x324] ss:$16 sps:$4 sm:$0xff]   ;;  %v5127_v57 = vld [vmem:[%s7602_s2 + $0x120] ss:$16 sps:$4 sm:$0xff]   ;;  %v5227_v63 = vld [vmem:[%s7602_s2 + $0x12c] ss:$16 sps:$4 sm:$0xff]  }
  0x1a   :  { %v5130_v58 = vld [vmem:[%s7602_s2 + $0x320] ss:$16 sps:$4 sm:$0xff]   ;;  %v5135_v59 = vld [vmem:[%s7602_s2 + $0x144] ss:$16 sps:$4 sm:$0xff]  }
  0x1b   :  { %991 = vmatpush1.bf16.msra.mxu0 %v5085_v29  ;;  %1032 = vmatpush1.bf16.msra.mxu1 %v5088_v30  ;;  %v5138_v60 = vld [vmem:[%s7602_s2 + $0x344] ss:$16 sps:$4 sm:$0xff]   ;;  %v5133_v0 = vld [vmem:[%s7602_s2 + $0x140] ss:$16 sps:$4 sm:$0xff]   ;;  %v5171_v29 = vld [vmem:[%s7602_s2 + $0x8] ss:$16 sps:$4 sm:$0xff]  }
  0x1c   :  { %992 = vmatprep.subr.bf16.mxu0 %v5093_v31  ;;  %1033 = vmatprep.subr.bf16.mxu1 %v5096_v32  ;;  %v22_v61 = vld [vmem:[%s7600_s0] sm:$0xff]  ;;  %v5174_v30 = vld [vmem:[%s7602_s2 + $0x208] ss:$16 sps:$4 sm:$0xff]   ;;  %v5179_v31 = vld [vmem:[%s7602_s2 + $0x2c] ss:$16 sps:$4 sm:$0xff]  }
  0x1d   :  { %v26_v62 = vcombine.high %v22_v61, %v22_v61  ;;  %v5136_v2 = vld [vmem:[%s7602_s2 + $0x340] ss:$16 sps:$4 sm:$0xff]   ;;  %v5141_v3 = vld [vmem:[%s7602_s2 + $0x164] ss:$16 sps:$4 sm:$0xff]   ;;  %v6162_v27 = vpack.c.bf16 %v22_v61, %v22_v61  ;;  %v5182_v32 = vld [vmem:[%s7602_s2 + $0x22c] ss:$16 sps:$4 sm:$0xff]  }
  0x1e   :  { %v5144_v5 = vld [vmem:[%s7602_s2 + $0x364] ss:$16 sps:$4 sm:$0xff]   ;;  %v5139_v7 = vld [vmem:[%s7602_s2 + $0x160] ss:$16 sps:$4 sm:$0xff]   ;;  %v5219_v61 = vld [vmem:[%s7602_s2 + $0x108] ss:$16 sps:$4 sm:$0xff]  }
  0x1f   :  { %993 = vmatpush1.bf16.msra.mxu0 %v5091_v33  ;;  %1034 = vmatpush1.bf16.msra.mxu1 %v5094_v34  ;;  %v6093_v4 = vpack.c.bf16 %v26_v62, %v26_v62  ;;  %v5142_v8 = vld [vmem:[%s7602_s2 + $0x360] ss:$16 sps:$4 sm:$0xff]   ;;  %v5147_v9 = vld [vmem:[%s7602_s2 + $0x184] ss:$16 sps:$4 sm:$0xff]   ;;  %v5177_v33 = vld [vmem:[%s7602_s2 + $0x28] ss:$16 sps:$4 sm:$0xff]  }
  0x20   :  { %994 = vmatprep.subr.bf16.mxu0 %v5099_v35  ;;  %1035 = vmatprep.subr.bf16.mxu1 %v5102_v36  ;;  %v5150_v10 = vld [vmem:[%s7602_s2 + $0x384] ss:$16 sps:$4 sm:$0xff]   ;;  %v5145_v11 = vld [vmem:[%s7602_s2 + $0x180] ss:$16 sps:$4 sm:$0xff]   ;;  %v5180_v34 = vld [vmem:[%s7602_s2 + $0x228] ss:$16 sps:$4 sm:$0xff]  }
  0x21   :  { %1018 = vmatprep.mubr.bf16.mxu0 %v6093_v4  ;;  %v5148_v12 = vld [vmem:[%s7602_s2 + $0x380] ss:$16 sps:$4 sm:$0xff]   ;;  %v5153_v13 = vld [vmem:[%s7602_s2 + $0x1a4] ss:$16 sps:$4 sm:$0xff]   ;;  %v5185_v35 = vld [vmem:[%s7602_s2 + $0x4c] ss:$16 sps:$4 sm:$0xff]  }
  0x22   :  { %v5156_v14 = vld [vmem:[%s7602_s2 + $0x3a4] ss:$16 sps:$4 sm:$0xff]   ;;  %v5151_v15 = vld [vmem:[%s7602_s2 + $0x1a0] ss:$16 sps:$4 sm:$0xff]   ;;  %v5188_v36 = vld [vmem:[%s7602_s2 + $0x24c] ss:$16 sps:$4 sm:$0xff]  }
  0x23   :  { %995 = vmatpush1.bf16.msra.mxu0 %v5097_v37  ;;  %1036 = vmatpush1.bf16.msra.mxu1 %v5100_v38  ;;  %v5154_v16 = vld [vmem:[%s7602_s2 + $0x3a0] ss:$16 sps:$4 sm:$0xff]   ;;  %v5159_v17 = vld [vmem:[%s7602_s2 + $0x1c4] ss:$16 sps:$4 sm:$0xff]   ;;  %v5183_v37 = vld [vmem:[%s7602_s2 + $0x48] ss:$16 sps:$4 sm:$0xff]  }
  0x24   :  { %996 = vmatprep.subr.bf16.mxu0 %v5105_v39  ;;  %1037 = vmatprep.subr.bf16.mxu1 %v5108_v40  ;;  %v5162_v18 = vld [vmem:[%s7602_s2 + $0x3c4] ss:$16 sps:$4 sm:$0xff]   ;;  %v5157_v19 = vld [vmem:[%s7602_s2 + $0x1c0] ss:$16 sps:$4 sm:$0xff]   ;;  %v5186_v38 = vld [vmem:[%s7602_s2 + $0x248] ss:$16 sps:$4 sm:$0xff]  }
  0x25   :  { %v5160_v20 = vld [vmem:[%s7602_s2 + $0x3c0] ss:$16 sps:$4 sm:$0xff]   ;;  %v5165_v21 = vld [vmem:[%s7602_s2 + $0x1e4] ss:$16 sps:$4 sm:$0xff]   ;;  %v5191_v39 = vld [vmem:[%s7602_s2 + $0x6c] ss:$16 sps:$4 sm:$0xff]  }
  0x26   :  { %v5168_v22 = vld [vmem:[%s7602_s2 + $0x3e4] ss:$16 sps:$4 sm:$0xff]   ;;  %v5163_v23 = vld [vmem:[%s7602_s2 + $0x1e0] ss:$16 sps:$4 sm:$0xff]   ;;  %v5194_v40 = vld [vmem:[%s7602_s2 + $0x26c] ss:$16 sps:$4 sm:$0xff]  }
  0x27   :  { %997 = vmatpush1.bf16.msra.mxu0 %v5103_v41  ;;  %1038 = vmatpush1.bf16.msra.mxu1 %v5106_v42  ;;  %v5166_v24 = vld [vmem:[%s7602_s2 + $0x3e0] ss:$16 sps:$4 sm:$0xff]   ;;  %v5189_v41 = vld [vmem:[%s7602_s2 + $0x68] ss:$16 sps:$4 sm:$0xff]  }
  0x28   :  { %998 = vmatprep.subr.bf16.mxu0 %v5111_v43  ;;  %1039 = vmatprep.subr.bf16.mxu1 %v5114_v44  ;;  %v5192_v42 = vld [vmem:[%s7602_s2 + $0x268] ss:$16 sps:$4 sm:$0xff]   ;;  %v5197_v43 = vld [vmem:[%s7602_s2 + $0x8c] ss:$16 sps:$4 sm:$0xff]  }
  0x29   :  { %v5200_v44 = vld [vmem:[%s7602_s2 + $0x28c] ss:$16 sps:$4 sm:$0xff]   ;;  %v5222_v62 = vld [vmem:[%s7602_s2 + $0x308] ss:$16 sps:$4 sm:$0xff]  }
  0x2b   :  { %999 = vmatpush1.bf16.msra.mxu0 %v5109_v45  ;;  %1040 = vmatpush1.bf16.msra.mxu1 %v5112_v46  ;;  %v5195_v45 = vld [vmem:[%s7602_s2 + $0x88] ss:$16 sps:$4 sm:$0xff]  }
  0x2c   :  { %1000 = vmatprep.subr.bf16.mxu0 %v5117_v47  ;;  %1041 = vmatprep.subr.bf16.mxu1 %v5120_v48  ;;  %v5198_v46 = vld [vmem:[%s7602_s2 + $0x288] ss:$16 sps:$4 sm:$0xff]   ;;  %v5203_v47 = vld [vmem:[%s7602_s2 + $0xac] ss:$16 sps:$4 sm:$0xff]  }
  0x2d   :  { %v5206_v48 = vld [vmem:[%s7602_s2 + $0x2ac] ss:$16 sps:$4 sm:$0xff]  }
  0x2f   :  { %1001 = vmatpush1.bf16.msra.mxu0 %v5115_v49  ;;  %1042 = vmatpush1.bf16.msra.mxu1 %v5118_v50  ;;  %v5201_v49 = vld [vmem:[%s7602_s2 + $0xa8] ss:$16 sps:$4 sm:$0xff]  }
  0x30   :  { %1002 = vmatprep.subr.bf16.mxu0 %v5123_v51  ;;  %1043 = vmatprep.subr.bf16.mxu1 %v5126_v52  ;;  %v5204_v50 = vld [vmem:[%s7602_s2 + $0x2a8] ss:$16 sps:$4 sm:$0xff]   ;;  %v5209_v51 = vld [vmem:[%s7602_s2 + $0xcc] ss:$16 sps:$4 sm:$0xff]  }
  0x31   :  { %v5212_v52 = vld [vmem:[%s7602_s2 + $0x2cc] ss:$16 sps:$4 sm:$0xff]  }
  0x33   :  { %1003 = vmatpush1.bf16.msra.mxu0 %v5121_v53  ;;  %1044 = vmatpush1.bf16.msra.mxu1 %v5124_v54  ;;  %v5207_v53 = vld [vmem:[%s7602_s2 + $0xc8] ss:$16 sps:$4 sm:$0xff]  }
  0x34   :  { %1004 = vmatprep.subr.bf16.mxu0 %v5129_v55  ;;  %1045 = vmatprep.subr.bf16.mxu1 %v5132_v56  ;;  %v5210_v54 = vld [vmem:[%s7602_s2 + $0x2c8] ss:$16 sps:$4 sm:$0xff]   ;;  %v5215_v55 = vld [vmem:[%s7602_s2 + $0xec] ss:$16 sps:$4 sm:$0xff]  }
  0x35   :  { %v5218_v56 = vld [vmem:[%s7602_s2 + $0x2ec] ss:$16 sps:$4 sm:$0xff]  }
  0x37   :  { %1005 = vmatpush1.bf16.msra.mxu0 %v5127_v57  ;;  %1046 = vmatpush1.bf16.msra.mxu1 %v5130_v58  ;;  %v5213_v57 = vld [vmem:[%s7602_s2 + $0xe8] ss:$16 sps:$4 sm:$0xff]  }
  0x38   :  { %1006 = vmatprep.subr.bf16.mxu0 %v5135_v59  ;;  %1047 = vmatprep.subr.bf16.mxu1 %v5138_v60  ;;  %v5216_v58 = vld [vmem:[%s7602_s2 + $0x2e8] ss:$16 sps:$4 sm:$0xff]   ;;  %v5221_v59 = vld [vmem:[%s7602_s2 + $0x10c] ss:$16 sps:$4 sm:$0xff]  }
  0x39   :  { %v5224_v60 = vld [vmem:[%s7602_s2 + $0x30c] ss:$16 sps:$4 sm:$0xff]  }
  0x3b   :  { %1007 = vmatpush1.bf16.msra.mxu0 %v5133_v0  ;;  %1048 = vmatpush1.bf16.msra.mxu1 %v5136_v2  ;;  %v5230_v0 = vld [vmem:[%s7602_s2 + $0x32c] ss:$16 sps:$4 sm:$0xff]   ;;  %v5228_v2 = vld [vmem:[%s7602_s2 + $0x328] ss:$16 sps:$4 sm:$0xff]  }
  0x3c   :  { %1008 = vmatprep.subr.bf16.mxu0 %v5141_v3  ;;  %1049 = vmatprep.subr.bf16.mxu1 %v5144_v5  ;;  %v5233_v3 = vld [vmem:[%s7602_s2 + $0x14c] ss:$16 sps:$4 sm:$0xff]   ;;  %v5231_v5 = vld [vmem:[%s7602_s2 + $0x148] ss:$16 sps:$4 sm:$0xff]  }
  0x3f   :  { %1009 = vmatpush1.bf16.msra.mxu0 %v5139_v7  ;;  %1050 = vmatpush1.bf16.msra.mxu1 %v5142_v8  ;;  %v5239_v7 = vld [vmem:[%s7602_s2 + $0x16c] ss:$16 sps:$4 sm:$0xff]  }
  0x40   :  { %1010 = vmatprep.subr.bf16.mxu0 %v5147_v9  ;;  %1051 = vmatprep.subr.bf16.mxu1 %v5150_v10  ;;  %v5242_v8 = vld [vmem:[%s7602_s2 + $0x36c] ss:$16 sps:$4 sm:$0xff]   ;;  %v5237_v9 = vld [vmem:[%s7602_s2 + $0x168] ss:$16 sps:$4 sm:$0xff]  }
  0x41   :  { %v5240_v10 = vld [vmem:[%s7602_s2 + $0x368] ss:$16 sps:$4 sm:$0xff]  }
  0x43   :  { %1011 = vmatpush1.bf16.msra.mxu0 %v5145_v11  ;;  %1052 = vmatpush1.bf16.msra.mxu1 %v5148_v12  ;;  %v5245_v11 = vld [vmem:[%s7602_s2 + $0x18c] ss:$16 sps:$4 sm:$0xff]  }
  0x44   :  { %1012 = vmatprep.subr.bf16.mxu0 %v5153_v13  ;;  %1053 = vmatprep.subr.bf16.mxu1 %v5156_v14  ;;  %v5248_v12 = vld [vmem:[%s7602_s2 + $0x38c] ss:$16 sps:$4 sm:$0xff]   ;;  %v5243_v13 = vld [vmem:[%s7602_s2 + $0x188] ss:$16 sps:$4 sm:$0xff]  }
  0x45   :  { %v5246_v14 = vld [vmem:[%s7602_s2 + $0x388] ss:$16 sps:$4 sm:$0xff]  }
  0x47   :  { %1013 = vmatpush1.bf16.msra.mxu0 %v5151_v15  ;;  %1054 = vmatpush1.bf16.msra.mxu1 %v5154_v16  ;;  %v5251_v15 = vld [vmem:[%s7602_s2 + $0x1ac] ss:$16 sps:$4 sm:$0xff]  }
  0x48   :  { %1014 = vmatprep.subr.bf16.mxu0 %v5159_v17  ;;  %1055 = vmatprep.subr.bf16.mxu1 %v5162_v18  ;;  %v5254_v16 = vld [vmem:[%s7602_s2 + $0x3ac] ss:$16 sps:$4 sm:$0xff]   ;;  %v5249_v17 = vld [vmem:[%s7602_s2 + $0x1a8] ss:$16 sps:$4 sm:$0xff]  }
  0x49   :  { %v5252_v18 = vld [vmem:[%s7602_s2 + $0x3a8] ss:$16 sps:$4 sm:$0xff]  }
  0x4b   :  { %1015 = vmatpush1.bf16.msra.mxu0 %v5157_v19  ;;  %1056 = vmatpush1.bf16.msra.mxu1 %v5160_v20  ;;  %v5257_v19 = vld [vmem:[%s7602_s2 + $0x1cc] ss:$16 sps:$4 sm:$0xff]  }
  0x4c   :  { %1016 = vmatprep.subr.bf16.mxu0 %v5165_v21  ;;  %1057 = vmatprep.subr.bf16.mxu1 %v5168_v22  ;;  %v5260_v20 = vld [vmem:[%s7602_s2 + $0x3cc] ss:$16 sps:$4 sm:$0xff]   ;;  %v5255_v21 = vld [vmem:[%s7602_s2 + $0x1c8] ss:$16 sps:$4 sm:$0xff]  }
  0x4d   :  { %v5258_v22 = vld [vmem:[%s7602_s2 + $0x3c8] ss:$16 sps:$4 sm:$0xff]  }
  0x4f   :  { %1017 = vmatpush1.bf16.msra.mxu0 %v5163_v23  ;;  %1058 = vmatpush1.bf16.msra.mxu1 %v5166_v24  ;;  %v5263_v23 = vld [vmem:[%s7602_s2 + $0x1ec] ss:$16 sps:$4 sm:$0xff]  }
  0x50   :  { %1068 = vmatprep.subr.bf16.mxu0 %v5173_v25  ;;  %1109 = vmatprep.subr.bf16.mxu1 %v5176_v26  ;;  %v5266_v24 = vld [vmem:[%s7602_s2 + $0x3ec] ss:$16 sps:$4 sm:$0xff]   ;;  %v5261_v25 = vld [vmem:[%s7602_s2 + $0x1e8] ss:$16 sps:$4 sm:$0xff]  }
  0x51   :  { %v5264_v26 = vld [vmem:[%s7602_s2 + $0x3e8] ss:$16 sps:$4 sm:$0xff]  }
  0x52   :  { %1019 = vmatmul.mubr.bf16.vlgmr.msra.gmra.mrb[4].mxu0 %v6162_v27  ;;  %1060 = vmatmul.mubr.bf16.vlgmr.msra.gmra.mrb[4].mxu1 %v6164_v28 }
  0x53   :  { %1069 = vmatpush1.bf16.msra.mxu0 %v5171_v29  ;;  %1110 = vmatpush1.bf16.msra.mxu1 %v5174_v30  ;;  %v5269_v29 = vld [vmem:[%s7602_s2 + $0x404] ss:$16 sps:$4 sm:$0xff]   ;;  %v5272_v30 = vld [vmem:[%s7602_s2 + $0x40c] ss:$16 sps:$4 sm:$0xff]  }
  0x54   :  { %1070 = vmatprep.subr.bf16.mxu0 %v5179_v31  ;;  %1111 = vmatprep.subr.bf16.mxu1 %v5182_v32  ;;  %v5267_v31 = vld [vmem:[%s7602_s2 + $0x400] ss:$16 sps:$4 sm:$0xff]   ;;  %v5270_v32 = vld [vmem:[%s7602_s2 + $0x408] ss:$16 sps:$4 sm:$0xff]  }
  0x55   :  { %1100 = vmatprep.mubr.bf16.mxu0 %v6093_v4  ;;  %1141 = vmatprep.mubr.bf16.mxu1 %v6098_v6  ;;  %v5236_v4 = vld [vmem:[%s7602_s2 + $0x34c] ss:$16 sps:$4 sm:$0xff]   ;;  %v5234_v6 = vld [vmem:[%s7602_s2 + $0x348] ss:$16 sps:$4 sm:$0xff]  }
  0x57   :  { %1071 = vmatpush1.bf16.msra.mxu0 %v5177_v33  ;;  %1112 = vmatpush1.bf16.msra.mxu1 %v5180_v34  ;;  %v5275_v33 = vld [vmem:[%s7602_s2 + $0x424] ss:$16 sps:$4 sm:$0xff]   ;;  %v5278_v34 = vld [vmem:[%s7602_s2 + $0x42c] ss:$16 sps:$4 sm:$0xff]  }
  0x58   :  { %1072 = vmatprep.subr.bf16.mxu0 %v5185_v35  ;;  %1113 = vmatprep.subr.bf16.mxu1 %v5188_v36  ;;  %v5273_v35 = vld [vmem:[%s7602_s2 + $0x420] ss:$16 sps:$4 sm:$0xff]   ;;  %v5276_v36 = vld [vmem:[%s7602_s2 + $0x428] ss:$16 sps:$4 sm:$0xff]  }
  0x5b   :  { %1073 = vmatpush1.bf16.msra.mxu0 %v5183_v37  ;;  %1114 = vmatpush1.bf16.msra.mxu1 %v5186_v38  ;;  %v5281_v37 = vld [vmem:[%s7602_s2 + $0x444] ss:$16 sps:$4 sm:$0xff]   ;;  %v5284_v38 = vld [vmem:[%s7602_s2 + $0x44c] ss:$16 sps:$4 sm:$0xff]  }
  0x5c   :  { %1074 = vmatprep.subr.bf16.mxu0 %v5191_v39  ;;  %1115 = vmatprep.subr.bf16.mxu1 %v5194_v40  ;;  %v5279_v39 = vld [vmem:[%s7602_s2 + $0x440] ss:$16 sps:$4 sm:$0xff]   ;;  %v5290_v40 = vld [vmem:[%s7602_s2 + $0x46c] ss:$16 sps:$4 sm:$0xff]  }
  0x5f   :  { %1075 = vmatpush1.bf16.msra.mxu0 %v5189_v41  ;;  %1116 = vmatpush1.bf16.msra.mxu1 %v5192_v42  ;;  %v5285_v41 = vld [vmem:[%s7602_s2 + $0x460] ss:$16 sps:$4 sm:$0xff]   ;;  %v5288_v42 = vld [vmem:[%s7602_s2 + $0x468] ss:$16 sps:$4 sm:$0xff]  }
  0x60   :  { %1076 = vmatprep.subr.bf16.mxu0 %v5197_v43  ;;  %1117 = vmatprep.subr.bf16.mxu1 %v5200_v44  ;;  %v5293_v43 = vld [vmem:[%s7602_s2 + $0x484] ss:$16 sps:$4 sm:$0xff]   ;;  %v5296_v44 = vld [vmem:[%s7602_s2 + $0x48c] ss:$16 sps:$4 sm:$0xff]  }
  0x63   :  { %1077 = vmatpush1.bf16.msra.mxu0 %v5195_v45  ;;  %1118 = vmatpush1.bf16.msra.mxu1 %v5198_v46  ;;  %v5291_v45 = vld [vmem:[%s7602_s2 + $0x480] ss:$16 sps:$4 sm:$0xff]   ;;  %v5294_v46 = vld [vmem:[%s7602_s2 + $0x488] ss:$16 sps:$4 sm:$0xff]  }
  0x64   :  { %1078 = vmatprep.subr.bf16.mxu0 %v5203_v47  ;;  %1119 = vmatprep.subr.bf16.mxu1 %v5206_v48  ;;  %v5299_v47 = vld [vmem:[%s7602_s2 + $0x4a4] ss:$16 sps:$4 sm:$0xff]   ;;  %v5302_v48 = vld [vmem:[%s7602_s2 + $0x4ac] ss:$16 sps:$4 sm:$0xff]  }
  0x67   :  { %1079 = vmatpush1.bf16.msra.mxu0 %v5201_v49  ;;  %1120 = vmatpush1.bf16.msra.mxu1 %v5204_v50  ;;  %v5297_v49 = vld [vmem:[%s7602_s2 + $0x4a0] ss:$16 sps:$4 sm:$0xff]   ;;  %v5300_v50 = vld [vmem:[%s7602_s2 + $0x4a8] ss:$16 sps:$4 sm:$0xff]  }
  0x68   :  { %1080 = vmatprep.subr.bf16.mxu0 %v5209_v51  ;;  %1121 = vmatprep.subr.bf16.mxu1 %v5212_v52  ;;  %v5305_v51 = vld [vmem:[%s7602_s2 + $0x4c4] ss:$16 sps:$4 sm:$0xff]   ;;  %v5308_v52 = vld [vmem:[%s7602_s2 + $0x4cc] ss:$16 sps:$4 sm:$0xff]  }
  0x6b   :  { %1081 = vmatpush1.bf16.msra.mxu0 %v5207_v53  ;;  %1122 = vmatpush1.bf16.msra.mxu1 %v5210_v54  ;;  %v5303_v53 = vld [vmem:[%s7602_s2 + $0x4c0] ss:$16 sps:$4 sm:$0xff]   ;;  %v5306_v54 = vld [vmem:[%s7602_s2 + $0x4c8] ss:$16 sps:$4 sm:$0xff]  }
  0x6c   :  { %1082 = vmatprep.subr.bf16.mxu0 %v5215_v55  ;;  %1123 = vmatprep.subr.bf16.mxu1 %v5218_v56  ;;  %v5311_v55 = vld [vmem:[%s7602_s2 + $0x4e4] ss:$16 sps:$4 sm:$0xff]   ;;  %v5314_v56 = vld [vmem:[%s7602_s2 + $0x4ec] ss:$16 sps:$4 sm:$0xff]  }
  0x6f   :  { %1083 = vmatpush1.bf16.msra.mxu0 %v5213_v57  ;;  %1124 = vmatpush1.bf16.msra.mxu1 %v5216_v58  ;;  %v5309_v57 = vld [vmem:[%s7602_s2 + $0x4e0] ss:$16 sps:$4 sm:$0xff]   ;;  %v5312_v58 = vld [vmem:[%s7602_s2 + $0x4e8] ss:$16 sps:$4 sm:$0xff]  }
  0x70   :  { %1084 = vmatprep.subr.bf16.mxu0 %v5221_v59  ;;  %1125 = vmatprep.subr.bf16.mxu1 %v5224_v60  ;;  %v5317_v59 = vld [vmem:[%s7602_s2 + $0x504] ss:$16 sps:$4 sm:$0xff]   ;;  %v5320_v60 = vld [vmem:[%s7602_s2 + $0x50c] ss:$16 sps:$4 sm:$0xff]  }
  0x73   :  { %1085 = vmatpush1.bf16.msra.mxu0 %v5219_v61  ;;  %1126 = vmatpush1.bf16.msra.mxu1 %v5222_v62  ;;  %v5315_v61 = vld [vmem:[%s7602_s2 + $0x500] ss:$16 sps:$4 sm:$0xff]   ;;  %v5318_v62 = vld [vmem:[%s7602_s2 + $0x508] ss:$16 sps:$4 sm:$0xff]  }
  0x74   :  { %1086 = vmatprep.subr.bf16.mxu0 %v5227_v63  ;;  %1127 = vmatprep.subr.bf16.mxu1 %v5230_v0  ;;  %v5323_v63 = vld [vmem:[%s7602_s2 + $0x524] ss:$16 sps:$4 sm:$0xff]   ;;  %v5326_v0 = vld [vmem:[%s7602_s2 + $0x52c] ss:$16 sps:$4 sm:$0xff]  }
  0x77   :  { %1087 = vmatpush1.bf16.msra.mxu0 %v5225_v1  ;;  %1128 = vmatpush1.bf16.msra.mxu1 %v5228_v2  ;;  %v5321_v1 = vld [vmem:[%s7602_s2 + $0x520] ss:$16 sps:$4 sm:$0xff]   ;;  %v5324_v2 = vld [vmem:[%s7602_s2 + $0x528] ss:$16 sps:$4 sm:$0xff]  }
  0x78   :  { %1088 = vmatprep.subr.bf16.mxu0 %v5233_v3  ;;  %1129 = vmatprep.subr.bf16.mxu1 %v5236_v4  ;;  %v5329_v3 = vld [vmem:[%s7602_s2 + $0x544] ss:$16 sps:$4 sm:$0xff]   ;;  %v5332_v4 = vld [vmem:[%s7602_s2 + $0x54c] ss:$16 sps:$4 sm:$0xff]  }
  0x7b   :  { %1089 = vmatpush1.bf16.msra.mxu0 %v5231_v5  ;;  %1130 = vmatpush1.bf16.msra.mxu1 %v5234_v6  ;;  %v5327_v5 = vld [vmem:[%s7602_s2 + $0x540] ss:$16 sps:$4 sm:$0xff]   ;;  %v5330_v6 = vld [vmem:[%s7602_s2 + $0x548] ss:$16 sps:$4 sm:$0xff]  }
  0x7c   :  { %1090 = vmatprep.subr.bf16.mxu0 %v5239_v7  ;;  %1131 = vmatprep.subr.bf16.mxu1 %v5242_v8  ;;  %v5335_v7 = vld [vmem:[%s7602_s2 + $0x564] ss:$16 sps:$4 sm:$0xff]   ;;  %v5338_v8 = vld [vmem:[%s7602_s2 + $0x56c] ss:$16 sps:$4 sm:$0xff]  }
  0x7f   :  { %1091 = vmatpush1.bf16.msra.mxu0 %v5237_v9  ;;  %1132 = vmatpush1.bf16.msra.mxu1 %v5240_v10  ;;  %v5333_v9 = vld [vmem:[%s7602_s2 + $0x560] ss:$16 sps:$4 sm:$0xff]   ;;  %v5336_v10 = vld [vmem:[%s7602_s2 + $0x568] ss:$16 sps:$4 sm:$0xff]  }
  0x80   :  { %1092 = vmatprep.subr.bf16.mxu0 %v5245_v11  ;;  %1133 = vmatprep.subr.bf16.mxu1 %v5248_v12  ;;  %v5341_v11 = vld [vmem:[%s7602_s2 + $0x584] ss:$16 sps:$4 sm:$0xff]   ;;  %v5344_v12 = vld [vmem:[%s7602_s2 + $0x58c] ss:$16 sps:$4 sm:$0xff]  }
  0x83   :  { %1093 = vmatpush1.bf16.msra.mxu0 %v5243_v13  ;;  %1134 = vmatpush1.bf16.msra.mxu1 %v5246_v14  ;;  %v5339_v13 = vld [vmem:[%s7602_s2 + $0x580] ss:$16 sps:$4 sm:$0xff]   ;;  %v5342_v14 = vld [vmem:[%s7602_s2 + $0x588] ss:$16 sps:$4 sm:$0xff]  }
  0x84   :  { %1094 = vmatprep.subr.bf16.mxu0 %v5251_v15  ;;  %1135 = vmatprep.subr.bf16.mxu1 %v5254_v16  ;;  %v5347_v15 = vld [vmem:[%s7602_s2 + $0x5a4] ss:$16 sps:$4 sm:$0xff]   ;;  %v5350_v16 = vld [vmem:[%s7602_s2 + $0x5ac] ss:$16 sps:$4 sm:$0xff]  }
  0x87   :  { %1095 = vmatpush1.bf16.msra.mxu0 %v5249_v17  ;;  %1136 = vmatpush1.bf16.msra.mxu1 %v5252_v18  ;;  %v5345_v17 = vld [vmem:[%s7602_s2 + $0x5a0] ss:$16 sps:$4 sm:$0xff]   ;;  %v5348_v18 = vld [vmem:[%s7602_s2 + $0x5a8] ss:$16 sps:$4 sm:$0xff]  }
  0x88   :  { %1096 = vmatprep.subr.bf16.mxu0 %v5257_v19  ;;  %1137 = vmatprep.subr.bf16.mxu1 %v5260_v20  ;;  %v5353_v19 = vld [vmem:[%s7602_s2 + $0x5c4] ss:$16 sps:$4 sm:$0xff]   ;;  %v5356_v20 = vld [vmem:[%s7602_s2 + $0x5cc] ss:$16 sps:$4 sm:$0xff]  }
  0x8b   :  { %1097 = vmatpush1.bf16.msra.mxu0 %v5255_v21  ;;  %1138 = vmatpush1.bf16.msra.mxu1 %v5258_v22  ;;  %v5351_v21 = vld [vmem:[%s7602_s2 + $0x5c0] ss:$16 sps:$4 sm:$0xff]   ;;  %v5354_v22 = vld [vmem:[%s7602_s2 + $0x5c8] ss:$16 sps:$4 sm:$0xff]  }
  0x8c   :  { %1098 = vmatprep.subr.bf16.mxu0 %v5263_v23  ;;  %1139 = vmatprep.subr.bf16.mxu1 %v5266_v24  ;;  %v5359_v23 = vld [vmem:[%s7602_s2 + $0x5e4] ss:$16 sps:$4 sm:$0xff]   ;;  %v5362_v24 = vld [vmem:[%s7602_s2 + $0x5ec] ss:$16 sps:$4 sm:$0xff]  }
  0x8f   :  { %1099 = vmatpush1.bf16.msra.mxu0 %v5261_v25  ;;  %1140 = vmatpush1.bf16.msra.mxu1 %v5264_v26  ;;  %v5357_v25 = vld [vmem:[%s7602_s2 + $0x5e0] ss:$16 sps:$4 sm:$0xff]   ;;  %v5360_v26 = vld [vmem:[%s7602_s2 + $0x5e8] ss:$16 sps:$4 sm:$0xff]  }
  0x90   :  { %1976 = vmatprep.subr.bf16.mxu0 %v5269_v29  ;;  %2058 = vmatprep.subr.bf16.mxu1 %v5272_v30  ;;  %v5365_v29 = vld [vmem:[%s7602_s2 + $0x604] ss:$16 sps:$4 sm:$0xff]   ;;  %v5368_v30 = vld [vmem:[%s7602_s2 + $0x60c] ss:$16 sps:$4 sm:$0xff]  }
  0x92   :  { %1101 = vmatmul.mubr.bf16.vlgmr.msra.gmra.mrb[8].mxu0 %v6162_v27  ;;  %1142 = vmatmul.mubr.bf16.vlgmr.msra.gmra.mrb[8].mxu1 %v6164_v28  ;;  %v5282_v27 = vld [vmem:[%s7602_s2 + $0x448] ss:$16 sps:$4 sm:$0xff]   ;;  %v5287_v28 = vld [vmem:[%s7602_s2 + $0x464] ss:$16 sps:$4 sm:$0xff]  }
  0x93   :  { %1977 = vmatpush1.bf16.msra.mxu0 %v5267_v31  ;;  %2059 = vmatpush1.bf16.msra.mxu1 %v5270_v32 }
  0x94   :  { %1978 = vmatprep.subr.bf16.mxu0 %v5275_v33  ;;  %2060 = vmatprep.subr.bf16.mxu1 %v5278_v34 }
  0x97   :  { %1979 = vmatpush1.bf16.msra.mxu0 %v5273_v35  ;;  %2061 = vmatpush1.bf16.msra.mxu1 %v5276_v36 }
  0x98   :  { %1980 = vmatprep.subr.bf16.mxu0 %v5281_v37  ;;  %2062 = vmatprep.subr.bf16.mxu1 %v5284_v38 }
  0x9b   :  { %1981 = vmatpush1.bf16.msra.mxu0 %v5279_v39  ;;  %2063 = vmatpush1.bf16.msra.mxu1 %v5282_v27  ;;  %v1152_v39 = vlaneseq }
  0x9c   :  { %1982 = vmatprep.subr.bf16.mxu0 %v5287_v28  ;;  %2064 = vmatprep.subr.bf16.mxu1 %v5290_v40 }
  0x9f   :  { %1983 = vmatpush1.bf16.msra.mxu0 %v5285_v41  ;;  %2065 = vmatpush1.bf16.msra.mxu1 %v5288_v42 }
  0xa0   :  { %1984 = vmatprep.subr.bf16.mxu0 %v5293_v43  ;;  %2066 = vmatprep.subr.bf16.mxu1 %v5296_v44 }
  0xa3   :  { %1985 = vmatpush1.bf16.msra.mxu0 %v5291_v45  ;;  %2067 = vmatpush1.bf16.msra.mxu1 %v5294_v46 }
  0xa4   :  { %1986 = vmatprep.subr.bf16.mxu0 %v5299_v47  ;;  %2068 = vmatprep.subr.bf16.mxu1 %v5302_v48 }
  0xa7   :  { %1987 = vmatpush1.bf16.msra.mxu0 %v5297_v49  ;;  %2069 = vmatpush1.bf16.msra.mxu1 %v5300_v50 }
  0xa8   :  { %1988 = vmatprep.subr.bf16.mxu0 %v5305_v51  ;;  %2070 = vmatprep.subr.bf16.mxu1 %v5308_v52 }
  0xab   :  { %1989 = vmatpush1.bf16.msra.mxu0 %v5303_v53  ;;  %2071 = vmatpush1.bf16.msra.mxu1 %v5306_v54 }
  0xac   :  { %1990 = vmatprep.subr.bf16.mxu0 %v5311_v55  ;;  %2072 = vmatprep.subr.bf16.mxu1 %v5314_v56 }
  0xaf   :  { %1991 = vmatpush1.bf16.msra.mxu0 %v5309_v57  ;;  %2073 = vmatpush1.bf16.msra.mxu1 %v5312_v58 }
  0xb0   :  { %1992 = vmatprep.subr.bf16.mxu0 %v5317_v59  ;;  %2074 = vmatprep.subr.bf16.mxu1 %v5320_v60 }
  0xb3   :  { %1993 = vmatpush1.bf16.msra.mxu0 %v5315_v61  ;;  %2075 = vmatpush1.bf16.msra.mxu1 %v5318_v62 }
  0xb4   :  { %1994 = vmatprep.subr.bf16.mxu0 %v5323_v63  ;;  %2076 = vmatprep.subr.bf16.mxu1 %v5326_v0 }
  0xb7   :  { %1995 = vmatpush1.bf16.msra.mxu0 %v5321_v1  ;;  %2077 = vmatpush1.bf16.msra.mxu1 %v5324_v2 }
  0xb8   :  { %1996 = vmatprep.subr.bf16.mxu0 %v5329_v3  ;;  %2078 = vmatprep.subr.bf16.mxu1 %v5332_v4 }
  0xbb   :  { %1997 = vmatpush1.bf16.msra.mxu0 %v5327_v5  ;;  %2079 = vmatpush1.bf16.msra.mxu1 %v5330_v6 }
  0xbc   :  { %1998 = vmatprep.subr.bf16.mxu0 %v5335_v7  ;;  %2080 = vmatprep.subr.bf16.mxu1 %v5338_v8 }
  0xbf   :  { %1999 = vmatpush1.bf16.msra.mxu0 %v5333_v9  ;;  %2081 = vmatpush1.bf16.msra.mxu1 %v5336_v10 }
  0xc0   :  { %2000 = vmatprep.subr.bf16.mxu0 %v5341_v11  ;;  %2082 = vmatprep.subr.bf16.mxu1 %v5344_v12 }
  0xc3   :  { %2001 = vmatpush1.bf16.msra.mxu0 %v5339_v13  ;;  %2083 = vmatpush1.bf16.msra.mxu1 %v5342_v14 }
  0xc4   :  { %2002 = vmatprep.subr.bf16.mxu0 %v5347_v15  ;;  %2084 = vmatprep.subr.bf16.mxu1 %v5350_v16 }
  0xc7   :  { %2003 = vmatpush1.bf16.msra.mxu0 %v5345_v17  ;;  %2085 = vmatpush1.bf16.msra.mxu1 %v5348_v18 }
  0xc8   :  { %2004 = vmatprep.subr.bf16.mxu0 %v5353_v19  ;;  %2086 = vmatprep.subr.bf16.mxu1 %v5356_v20 }
  0xcb   :  { %2005 = vmatpush1.bf16.msra.mxu0 %v5351_v21  ;;  %2087 = vmatpush1.bf16.msra.mxu1 %v5354_v22 }
  0xcc   :  { %2006 = vmatprep.subr.bf16.mxu0 %v5359_v23  ;;  %2088 = vmatprep.subr.bf16.mxu1 %v5362_v24 }
  0xcf   :  { %2007 = vmatpush1.bf16.msra.mxu0 %v5357_v25  ;;  %2089 = vmatpush1.bf16.msra.mxu1 %v5360_v26 }
  0xd0   :  { %2017 = vmatprep.subr.bf16.mxu0 %v5365_v29  ;;  %2099 = vmatprep.subr.bf16.mxu1 %v5368_v30 }
  0xe5   :  { %v298_v31 = vpop.f32.mrb[0].mxu0  ;;  %v6556_v32 = vpop.f32.mrb[0].mxu1 }
  0xe6   :  { %v300_v33 = vpop.f32.mrb[1].mxu0  ;;  %v6558_v34 = vpop.f32.mrb[1].mxu1 }
  0xe7   :  { %v302_v35 = vpop.f32.mrb[2].mxu0  ;;  %v343_v36 = vpop.f32.mrb[2].mxu1 }
  0xe8   :  { %v303_v37 = vpop.f32.mrb[3].mxu0  ;;  %v344_v38 = vpop.f32.mrb[3].mxu1 }
  0xe9   :  { %10 = vsyncpa [#allocation3], 0  ;;  %v6560_v27 = vshrl.u32 %v1152_v39, 7  ;;  %v6568_v40 = vld [vmem:[%s7604_s4] sm:$0xf] }
  0xea   :  { %v5363_v61 = vld [vmem:[%s7602_s2 + $0x600] ss:$16 sps:$4 sm:$0xff]   ;;  %v5366_v62 = vld [vmem:[%s7602_s2 + $0x608] ss:$16 sps:$4 sm:$0xff]   ;;  %v5371_v0 = vld [vmem:[%s7602_s2 + $0x624] ss:$16 sps:$4 sm:$0xff]  }
  0xeb   :  { %v6563_v28 = vsub.s32 0, %v6560_v27  ;;  %v6571_v41 = vsub.s32 1, %v6560_v27  ;;  %v5374_v1 = vld [vmem:[%s7602_s2 + $0x62c] ss:$16 sps:$4 sm:$0xff]   ;;  %v5369_v2 = vld [vmem:[%s7602_s2 + $0x620] ss:$16 sps:$4 sm:$0xff]  }
  0xec   :  { %v5372_v3 = vld [vmem:[%s7602_s2 + $0x628] ss:$16 sps:$4 sm:$0xff]   ;;  %v5377_v4 = vld [vmem:[%s7602_s2 + $0x644] ss:$16 sps:$4 sm:$0xff]   ;;  %v5380_v5 = vld [vmem:[%s7602_s2 + $0x64c] ss:$16 sps:$4 sm:$0xff]  }
  0xed   :  { %v1155_v45 = vrot.slane %v6568_v40, %v6563_v28  ;;  %v1159_v49 = vrot.slane %v6568_v40, %v6571_v41  ;;  %v5375_v6 = vld [vmem:[%s7602_s2 + $0x640] ss:$16 sps:$4 sm:$0xff]   ;;  %v5378_v7 = vld [vmem:[%s7602_s2 + $0x648] ss:$16 sps:$4 sm:$0xff]   ;;  %v5383_v8 = vld [vmem:[%s7602_s2 + $0x664] ss:$16 sps:$4 sm:$0xff]  }
  0xee   :  { %v5386_v9 = vld [vmem:[%s7602_s2 + $0x66c] ss:$16 sps:$4 sm:$0xff]   ;;  %v5381_v10 = vld [vmem:[%s7602_s2 + $0x660] ss:$16 sps:$4 sm:$0xff]   ;;  %v5384_v11 = vld [vmem:[%s7602_s2 + $0x668] ss:$16 sps:$4 sm:$0xff]  }
  0xef   :  { %v5389_v12 = vld [vmem:[%s7602_s2 + $0x684] ss:$16 sps:$4 sm:$0xff]   ;;  %v5392_v13 = vld [vmem:[%s7602_s2 + $0x68c] ss:$16 sps:$4 sm:$0xff]   ;;  %v5387_v14 = vld [vmem:[%s7602_s2 + $0x680] ss:$16 sps:$4 sm:$0xff]  }
  0xf0   :  { %v5390_v15 = vld [vmem:[%s7602_s2 + $0x688] ss:$16 sps:$4 sm:$0xff]   ;;  %v5395_v16 = vld [vmem:[%s7602_s2 + $0x6a4] ss:$16 sps:$4 sm:$0xff]   ;;  %v5398_v17 = vld [vmem:[%s7602_s2 + $0x6ac] ss:$16 sps:$4 sm:$0xff]  }
  0xf1   :  { %v5393_v18 = vld [vmem:[%s7602_s2 + $0x6a0] ss:$16 sps:$4 sm:$0xff]   ;;  %v5396_v19 = vld [vmem:[%s7602_s2 + $0x6a8] ss:$16 sps:$4 sm:$0xff]   ;;  %v5401_v20 = vld [vmem:[%s7602_s2 + $0x6c4] ss:$16 sps:$4 sm:$0xff]  }
  0xf2   :  { %v5404_v21 = vld [vmem:[%s7602_s2 + $0x6cc] ss:$16 sps:$4 sm:$0xff]   ;;  %v5399_v22 = vld [vmem:[%s7602_s2 + $0x6c0] ss:$16 sps:$4 sm:$0xff]   ;;  %v5402_v23 = vld [vmem:[%s7602_s2 + $0x6c8] ss:$16 sps:$4 sm:$0xff]  }
  0xf3   :  { %v5407_v24 = vld [vmem:[%s7602_s2 + $0x6e4] ss:$16 sps:$4 sm:$0xff]   ;;  %v5410_v25 = vld [vmem:[%s7602_s2 + $0x6ec] ss:$16 sps:$4 sm:$0xff]   ;;  %v5405_v26 = vld [vmem:[%s7602_s2 + $0x6e0] ss:$16 sps:$4 sm:$0xff]  }
  0xf4   :  { %v5408_v29 = vld [vmem:[%s7602_s2 + $0x6e8] ss:$16 sps:$4 sm:$0xff]   ;;  %v5413_v30 = vld [vmem:[%s7602_s2 + $0x704] ss:$16 sps:$4 sm:$0xff]   ;;  %v5422_v37 = vld [vmem:[%s7602_s2 + $0x72c] ss:$16 sps:$4 sm:$0xff]  }
  0xf5   :  { %v5414_v35 = vld [vmem:[%s7602_s2 + $0x708] ss:$16 sps:$4 sm:$0xff]   ;;  %v5419_v36 = vld [vmem:[%s7602_s2 + $0x724] ss:$16 sps:$4 sm:$0xff]   ;;  %v5417_v38 = vld [vmem:[%s7602_s2 + $0x720] ss:$16 sps:$4 sm:$0xff]  }
  0xf6   :  { %v5420_v39 = vld [vmem:[%s7602_s2 + $0x728] ss:$16 sps:$4 sm:$0xff]  }
 0x125   :  { %v1020_v42 = vpop.f32.mrb[4].mxu0  ;;  %v1061_v43 = vpop.f32.mrb[4].mxu1 }
 0x126   :  { %v1021_v44 = vadd.f32 %v1020_v42, %v298_v31  ;;  %v1022_v46 = vpop.f32.mrb[5].mxu0  ;;  %v1063_v47 = vpop.f32.mrb[5].mxu1  ;;  %v5416_v31 = vld [vmem:[%s7602_s2 + $0x70c] ss:$16 sps:$4 sm:$0xff]   ;;  %v5425_v42 = vld [vmem:[%s7602_s2 + $0x744] ss:$16 sps:$4 sm:$0xff]  }
 0x127   :  { %v1023_v48 = vadd.f32 %v1022_v46, %v300_v33  ;;  %v1024_v50 = vpop.f32.mrb[6].mxu0  ;;  %v1065_v51 = vpop.f32.mrb[6].mxu1  ;;  %v5411_v33 = vld [vmem:[%s7602_s2 + $0x700] ss:$16 sps:$4 sm:$0xff]   ;;  %v5431_v46 = vld [vmem:[%s7602_s2 + $0x764] ss:$16 sps:$4 sm:$0xff]  }
 0x128   :  { %v1062_v52 = vadd.f32 %v1061_v43, %v1021_v44  ;;  %v1025_v53 = vpop.f32.mrb[7].mxu0  ;;  %v1066_v54 = vpop.f32.mrb[7].mxu1  ;;  %v5428_v43 = vld [vmem:[%s7602_s2 + $0x74c] ss:$16 sps:$4 sm:$0xff]   ;;  %v5423_v44 = vld [vmem:[%s7602_s2 + $0x740] ss:$16 sps:$4 sm:$0xff]  }
 0x129   :  { %v1064_v55 = vadd.f32 %v1063_v47, %v1023_v48  ;;  %v5434_v47 = vld [vmem:[%s7602_s2 + $0x76c] ss:$16 sps:$4 sm:$0xff]   ;;  %v5429_v48 = vld [vmem:[%s7602_s2 + $0x760] ss:$16 sps:$4 sm:$0xff]   ;;  %v5437_v50 = vld [vmem:[%s7602_s2 + $0x784] ss:$16 sps:$4 sm:$0xff]  }
 0x12a   :  { %v1172_v56 = vadd.f32 %v1155_v45, %v1062_v52  ;;  %v5426_v45 = vld [vmem:[%s7602_s2 + $0x748] ss:$16 sps:$4 sm:$0xff]   ;;  %v5440_v51 = vld [vmem:[%s7602_s2 + $0x78c] ss:$16 sps:$4 sm:$0xff]   ;;  %v5435_v52 = vld [vmem:[%s7602_s2 + $0x780] ss:$16 sps:$4 sm:$0xff]  }
 0x12b   :  { %v1173_v57 = vadd.f32 %v1159_v49, %v1064_v55  ;;  %v5432_v49 = vld [vmem:[%s7602_s2 + $0x768] ss:$16 sps:$4 sm:$0xff]   ;;  %v5443_v54 = vld [vmem:[%s7602_s2 + $0x7a4] ss:$16 sps:$4 sm:$0xff]   ;;  %v5446_v55 = vld [vmem:[%s7602_s2 + $0x7ac] ss:$16 sps:$4 sm:$0xff]  }
 0x12c   :  { %v1176_v58 = vmax.f32 %v1172_v56, 0.0  ;;  %v5438_v53 = vld [vmem:[%s7602_s2 + $0x788] ss:$16 sps:$4 sm:$0xff]   ;;  %v6734_v56 = vsub.s32 2, %v6560_v27 }
 0x12d   :  { %v1177_v59 = vmax.f32 %v1173_v57, 0.0  ;;  %v6737_v57 = vsub.s32 3, %v6560_v27 }
 0x12e   :  { %v1180_v63 = vpack.c.bf16 %v1176_v58, %v1176_v58  ;;  %v5441_v58 = vld [vmem:[%s7602_s2 + $0x7a0] ss:$16 sps:$4 sm:$0xff]  }
 0x12f   :  { %v1181_v60 = vpack.c.bf16 %v1177_v59, %v1177_v59  ;;  %v5444_v59 = vld [vmem:[%s7602_s2 + $0x7a8] ss:$16 sps:$4 sm:$0xff]  }
 0x131   :  { %2008 = vmatprep.mubr.bf16.mxu0 %v1181_v60  ;;  %2090 = vmatprep.mubr.bf16.mxu1 %v1181_v60  ;;  %v5449_v60 = vld [vmem:[%s7602_s2 + $0x7c4] ss:$16 sps:$4 sm:$0xff]  }
 0x132   :  { %2009 = vmatmul.mubr.bf16.vlgmr.msra.gmra.mrb[12].mxu0 %v1180_v63  ;;  %2091 = vmatmul.mubr.bf16.vlgmr.msra.gmra.mrb[12].mxu1 %v1180_v63 }
 0x133   :  { %2018 = vmatpush1.bf16.msra.mxu0 %v5363_v61  ;;  %2100 = vmatpush1.bf16.msra.mxu1 %v5366_v62  ;;  %v5452_v61 = vld [vmem:[%s7602_s2 + $0x7cc] ss:$16 sps:$4 sm:$0xff]  }
 0x134   :  { %2019 = vmatprep.subr.bf16.mxu0 %v5371_v0  ;;  %2101 = vmatprep.subr.bf16.mxu1 %v5374_v1  ;;  %v1163_v0 = vrot.slane %v6568_v40, %v6734_v56 }
 0x137   :  { %2020 = vmatpush1.bf16.msra.mxu0 %v5369_v2  ;;  %2102 = vmatpush1.bf16.msra.mxu1 %v5372_v3 }
 0x138   :  { %2021 = vmatprep.subr.bf16.mxu0 %v5377_v4  ;;  %2103 = vmatprep.subr.bf16.mxu1 %v5380_v5  ;;  %v1167_v4 = vrot.slane %v6568_v40, %v6737_v57  ;;  %v5458_v40 = vld [vmem:[%s7602_s2 + $0x7ec] ss:$16 sps:$4 sm:$0xff]  }
 0x13b   :  { %2022 = vmatpush1.bf16.msra.mxu0 %v5375_v6  ;;  %2104 = vmatpush1.bf16.msra.mxu1 %v5378_v7  ;;  %v5447_v7 = vld [vmem:[%s7602_s2 + $0x7c0] ss:$16 sps:$4 sm:$0xff]  }
 0x13c   :  { %2023 = vmatprep.subr.bf16.mxu0 %v5383_v8  ;;  %2105 = vmatprep.subr.bf16.mxu1 %v5386_v9 }
 0x13f   :  { %2024 = vmatpush1.bf16.msra.mxu0 %v5381_v10  ;;  %2106 = vmatpush1.bf16.msra.mxu1 %v5384_v11 }
 0x140   :  { %2025 = vmatprep.subr.bf16.mxu0 %v5389_v12  ;;  %2107 = vmatprep.subr.bf16.mxu1 %v5392_v13 }
 0x143   :  { %2026 = vmatpush1.bf16.msra.mxu0 %v5387_v14  ;;  %2108 = vmatpush1.bf16.msra.mxu1 %v5390_v15  ;;  %v5453_v14 = vld [vmem:[%s7602_s2 + $0x7e0] ss:$16 sps:$4 sm:$0xff]   ;;  %v5456_v15 = vld [vmem:[%s7602_s2 + $0x7e8] ss:$16 sps:$4 sm:$0xff]  }
 0x144   :  { %2027 = vmatprep.subr.bf16.mxu0 %v5395_v16  ;;  %2109 = vmatprep.subr.bf16.mxu1 %v5398_v17  ;;  %v5461_v17 = vld [vmem:[%s7602_s2 + $0x804] ss:$16 sps:$4 sm:$0xff]  }
 0x147   :  { %2028 = vmatpush1.bf16.msra.mxu0 %v5393_v18  ;;  %2110 = vmatpush1.bf16.msra.mxu1 %v5396_v19  ;;  %v5464_v18 = vld [vmem:[%s7602_s2 + $0x80c] ss:$16 sps:$4 sm:$0xff]  }
 0x148   :  { %2029 = vmatprep.subr.bf16.mxu0 %v5401_v20  ;;  %2111 = vmatprep.subr.bf16.mxu1 %v5404_v21  ;;  %v5459_v21 = vld [vmem:[%s7602_s2 + $0x800] ss:$16 sps:$4 sm:$0xff]  }
 0x14b   :  { %2030 = vmatpush1.bf16.msra.mxu0 %v5399_v22  ;;  %2112 = vmatpush1.bf16.msra.mxu1 %v5402_v23  ;;  %v5462_v22 = vld [vmem:[%s7602_s2 + $0x808] ss:$16 sps:$4 sm:$0xff]  }
 0x14c   :  { %2031 = vmatprep.subr.bf16.mxu0 %v5407_v24  ;;  %2113 = vmatprep.subr.bf16.mxu1 %v5410_v25  ;;  %v5467_v24 = vld [vmem:[%s7602_s2 + $0x824] ss:$16 sps:$4 sm:$0xff]   ;;  %v5470_v25 = vld [vmem:[%s7602_s2 + $0x82c] ss:$16 sps:$4 sm:$0xff]  }
 0x14f   :  { %2032 = vmatpush1.bf16.msra.mxu0 %v5405_v26  ;;  %2114 = vmatpush1.bf16.msra.mxu1 %v5408_v29  ;;  %v5465_v26 = vld [vmem:[%s7602_s2 + $0x820] ss:$16 sps:$4 sm:$0xff]   ;;  %v5468_v29 = vld [vmem:[%s7602_s2 + $0x828] ss:$16 sps:$4 sm:$0xff]  }
 0x150   :  { %2033 = vmatprep.subr.bf16.mxu0 %v5413_v30  ;;  %2115 = vmatprep.subr.bf16.mxu1 %v5416_v31  ;;  %v5473_v30 = vld [vmem:[%s7602_s2 + $0x844] ss:$16 sps:$4 sm:$0xff]   ;;  %v5476_v31 = vld [vmem:[%s7602_s2 + $0x84c] ss:$16 sps:$4 sm:$0xff]  }
 0x153   :  { %2034 = vmatpush1.bf16.msra.mxu0 %v5411_v33  ;;  %2116 = vmatpush1.bf16.msra.mxu1 %v5414_v35  ;;  %v5471_v33 = vld [vmem:[%s7602_s2 + $0x840] ss:$16 sps:$4 sm:$0xff]   ;;  %v5474_v35 = vld [vmem:[%s7602_s2 + $0x848] ss:$16 sps:$4 sm:$0xff]  }
 0x154   :  { %2035 = vmatprep.subr.bf16.mxu0 %v5419_v36  ;;  %2117 = vmatprep.subr.bf16.mxu1 %v5422_v37  ;;  %v5479_v36 = vld [vmem:[%s7602_s2 + $0x864] ss:$16 sps:$4 sm:$0xff]   ;;  %v5482_v37 = vld [vmem:[%s7602_s2 + $0x86c] ss:$16 sps:$4 sm:$0xff]  }
 0x157   :  { %2036 = vmatpush1.bf16.msra.mxu0 %v5417_v38  ;;  %2118 = vmatpush1.bf16.msra.mxu1 %v5420_v39  ;;  %v5477_v38 = vld [vmem:[%s7602_s2 + $0x860] ss:$16 sps:$4 sm:$0xff]   ;;  %v5480_v39 = vld [vmem:[%s7602_s2 + $0x868] ss:$16 sps:$4 sm:$0xff]  }
 0x158   :  { %2037 = vmatprep.subr.bf16.mxu0 %v5425_v42  ;;  %2119 = vmatprep.subr.bf16.mxu1 %v5428_v43  ;;  %v5485_v42 = vld [vmem:[%s7602_s2 + $0x884] ss:$16 sps:$4 sm:$0xff]   ;;  %v5488_v43 = vld [vmem:[%s7602_s2 + $0x88c] ss:$16 sps:$4 sm:$0xff]  }
 0x15b   :  { %2038 = vmatpush1.bf16.msra.mxu0 %v5423_v44  ;;  %2120 = vmatpush1.bf16.msra.mxu1 %v5426_v45  ;;  %v5483_v44 = vld [vmem:[%s7602_s2 + $0x880] ss:$16 sps:$4 sm:$0xff]   ;;  %v5486_v45 = vld [vmem:[%s7602_s2 + $0x888] ss:$16 sps:$4 sm:$0xff]  }
 0x15c   :  { %2039 = vmatprep.subr.bf16.mxu0 %v5431_v46  ;;  %2121 = vmatprep.subr.bf16.mxu1 %v5434_v47  ;;  %v5491_v46 = vld [vmem:[%s7602_s2 + $0x8a4] ss:$16 sps:$4 sm:$0xff]   ;;  %v5494_v47 = vld [vmem:[%s7602_s2 + $0x8ac] ss:$16 sps:$4 sm:$0xff]  }
 0x15f   :  { %2040 = vmatpush1.bf16.msra.mxu0 %v5429_v48  ;;  %2122 = vmatpush1.bf16.msra.mxu1 %v5432_v49  ;;  %v5489_v48 = vld [vmem:[%s7602_s2 + $0x8a0] ss:$16 sps:$4 sm:$0xff]   ;;  %v5492_v49 = vld [vmem:[%s7602_s2 + $0x8a8] ss:$16 sps:$4 sm:$0xff]  }
 0x160   :  { %2041 = vmatprep.subr.bf16.mxu0 %v5437_v50  ;;  %2123 = vmatprep.subr.bf16.mxu1 %v5440_v51  ;;  %v5497_v50 = vld [vmem:[%s7602_s2 + $0x8c4] ss:$16 sps:$4 sm:$0xff]   ;;  %v5500_v51 = vld [vmem:[%s7602_s2 + $0x8cc] ss:$16 sps:$4 sm:$0xff]  }
 0x163   :  { %2042 = vmatpush1.bf16.msra.mxu0 %v5435_v52  ;;  %2124 = vmatpush1.bf16.msra.mxu1 %v5438_v53  ;;  %v5495_v52 = vld [vmem:[%s7602_s2 + $0x8c0] ss:$16 sps:$4 sm:$0xff]   ;;  %v5498_v53 = vld [vmem:[%s7602_s2 + $0x8c8] ss:$16 sps:$4 sm:$0xff]  }
 0x164   :  { %2043 = vmatprep.subr.bf16.mxu0 %v5443_v54  ;;  %2125 = vmatprep.subr.bf16.mxu1 %v5446_v55  ;;  %v5503_v54 = vld [vmem:[%s7602_s2 + $0x8e4] ss:$16 sps:$4 sm:$0xff]   ;;  %v5506_v55 = vld [vmem:[%s7602_s2 + $0x8ec] ss:$16 sps:$4 sm:$0xff]  }
 0x165   :  { %v1102_v27 = vpop.f32.mrb[8].mxu0  ;;  %v1143_v62 = vpop.f32.mrb[8].mxu1 }
 0x166   :  { %v1103_v63 = vadd.f32 %v1102_v27, %v6556_v32  ;;  %v1104_v1 = vpop.f32.mrb[9].mxu0  ;;  %v1145_v2 = vpop.f32.mrb[9].mxu1  ;;  %v5450_v32 = vld [vmem:[%s7602_s2 + $0x7c8] ss:$16 sps:$4 sm:$0xff]   ;;  %v5507_v27 = vld [vmem:[%s7602_s2 + $0x900] ss:$16 sps:$4 sm:$0xff]  }
 0x167   :  { %v1105_v3 = vadd.f32 %v1104_v1, %v6558_v34  ;;  %v1106_v5 = vpop.f32.mrb[10].mxu0  ;;  %v1147_v6 = vpop.f32.mrb[10].mxu1  ;;  %2044 = vmatpush1.bf16.msra.mxu0 %v5441_v58  ;;  %2126 = vmatpush1.bf16.msra.mxu1 %v5444_v59  ;;  %v5455_v34 = vld [vmem:[%s7602_s2 + $0x7e4] ss:$16 sps:$4 sm:$0xff]   ;;  %v5501_v58 = vld [vmem:[%s7602_s2 + $0x8e0] ss:$16 sps:$4 sm:$0xff]  }
 0x168   :  { %v1144_v8 = vadd.f32 %v1143_v62, %v1103_v63  ;;  %v1107_v9 = vpop.f32.mrb[11].mxu0  ;;  %v1148_v10 = vpop.f32.mrb[11].mxu1  ;;  %2045 = vmatprep.subr.bf16.mxu0 %v5449_v60  ;;  %2127 = vmatprep.subr.bf16.mxu1 %v5452_v61  ;;  %v5504_v59 = vld [vmem:[%s7602_s2 + $0x8e8] ss:$16 sps:$4 sm:$0xff]   ;;  %v5509_v60 = vld [vmem:[%s7602_s2 + $0x904] ss:$16 sps:$4 sm:$0xff]  }
 0x169   :  { %v1146_v11 = vadd.f32 %v1145_v2, %v1105_v3  ;;  %v5512_v61 = vld [vmem:[%s7602_s2 + $0x90c] ss:$16 sps:$4 sm:$0xff]   ;;  %v5510_v62 = vld [vmem:[%s7602_s2 + $0x908] ss:$16 sps:$4 sm:$0xff]   ;;  %v5515_v63 = vld [vmem:[%s7602_s2 + $0x924] ss:$16 sps:$4 sm:$0xff]  }
 0x16a   :  { %v1174_v12 = vadd.f32 %v1163_v0, %v1144_v8  ;;  %v5518_v0 = vld [vmem:[%s7602_s2 + $0x92c] ss:$16 sps:$4 sm:$0xff]   ;;  %v5513_v1 = vld [vmem:[%s7602_s2 + $0x920] ss:$16 sps:$4 sm:$0xff]   ;;  %v5516_v2 = vld [vmem:[%s7602_s2 + $0x928] ss:$16 sps:$4 sm:$0xff]  }
 0x16b   :  { %v1175_v13 = vadd.f32 %v1167_v4, %v1146_v11  ;;  %2046 = vmatpush1.bf16.msra.mxu0 %v5447_v7  ;;  %2128 = vmatpush1.bf16.msra.mxu1 %v5450_v32  ;;  %v5521_v3 = vld [vmem:[%s7602_s2 + $0x944] ss:$16 sps:$4 sm:$0xff]   ;;  %v5524_v4 = vld [vmem:[%s7602_s2 + $0x94c] ss:$16 sps:$4 sm:$0xff]   ;;  %v5519_v5 = vld [vmem:[%s7602_s2 + $0x940] ss:$16 sps:$4 sm:$0xff]  }
 0x16c   :  { %v1178_v16 = vmax.f32 %v1174_v12, 0.0  ;;  %2047 = vmatprep.subr.bf16.mxu0 %v5455_v34  ;;  %2129 = vmatprep.subr.bf16.mxu1 %v5458_v40  ;;  %v5522_v6 = vld [vmem:[%s7602_s2 + $0x948] ss:$16 sps:$4 sm:$0xff]   ;;  %v5527_v7 = vld [vmem:[%s7602_s2 + $0x964] ss:$16 sps:$4 sm:$0xff]  }
 0x16d   :  { %v1179_v19 = vmax.f32 %v1175_v13, 0.0  ;;  %v5530_v32 = vld [vmem:[%s7602_s2 + $0x96c] ss:$16 sps:$4 sm:$0xff]   ;;  %v5525_v8 = vld [vmem:[%s7602_s2 + $0x960] ss:$16 sps:$4 sm:$0xff]  }
 0x16e   :  { %v1182_v23 = vpack.c.bf16 %v1178_v16, %v1178_v16  ;;  %v5528_v9 = vld [vmem:[%s7602_s2 + $0x968] ss:$16 sps:$4 sm:$0xff]   ;;  %v5533_v10 = vld [vmem:[%s7602_s2 + $0x984] ss:$16 sps:$4 sm:$0xff]   ;;  %v5536_v34 = vld [vmem:[%s7602_s2 + $0x98c] ss:$16 sps:$4 sm:$0xff]  }
 0x16f   :  { %v1183_v20 = vpack.c.bf16 %v1179_v19, %v1179_v19  ;;  %2048 = vmatpush1.bf16.msra.mxu0 %v5453_v14  ;;  %2130 = vmatpush1.bf16.msra.mxu1 %v5456_v15  ;;  %v5531_v40 = vld [vmem:[%s7602_s2 + $0x980] ss:$16 sps:$4 sm:$0xff]   ;;  %v5534_v11 = vld [vmem:[%s7602_s2 + $0x988] ss:$16 sps:$4 sm:$0xff]   ;;  %v5539_v12 = vld [vmem:[%s7602_s2 + $0x9a4] ss:$16 sps:$4 sm:$0xff]  }
 0x170   :  { %2940 = vmatprep.subr.bf16.mxu0 %v5461_v17  ;;  %3022 = vmatprep.subr.bf16.mxu1 %v5464_v18  ;;  %v5542_v13 = vld [vmem:[%s7602_s2 + $0x9ac] ss:$16 sps:$4 sm:$0xff]   ;;  %v5537_v14 = vld [vmem:[%s7602_s2 + $0x9a0] ss:$16 sps:$4 sm:$0xff]   ;;  %v5540_v15 = vld [vmem:[%s7602_s2 + $0x9a8] ss:$16 sps:$4 sm:$0xff]  }
 0x171   :  { %2049 = vmatprep.mubr.bf16.mxu0 %v1183_v20  ;;  %2131 = vmatprep.mubr.bf16.mxu1 %v1183_v20  ;;  %v5545_v16 = vld [vmem:[%s7602_s2 + $0x9c4] ss:$16 sps:$4 sm:$0xff]   ;;  %v5548_v17 = vld [vmem:[%s7602_s2 + $0x9cc] ss:$16 sps:$4 sm:$0xff]   ;;  %v5543_v18 = vld [vmem:[%s7602_s2 + $0x9c0] ss:$16 sps:$4 sm:$0xff]  }
 0x172   :  { %2050 = vmatmul.mubr.bf16.vlgmr.msra.gmra.mrb[12].mxu0 %v1182_v23  ;;  %2132 = vmatmul.mubr.bf16.vlgmr.msra.gmra.mrb[12].mxu1 %v1182_v23  ;;  %v5546_v19 = vld [vmem:[%s7602_s2 + $0x9c8] ss:$16 sps:$4 sm:$0xff]   ;;  %v5551_v20 = vld [vmem:[%s7602_s2 + $0x9e4] ss:$16 sps:$4 sm:$0xff]  }
 0x173   :  { %2941 = vmatpush1.bf16.msra.mxu0 %v5459_v21  ;;  %3023 = vmatpush1.bf16.msra.mxu1 %v5462_v22  ;;  %v5554_v21 = vld [vmem:[%s7602_s2 + $0x9ec] ss:$16 sps:$4 sm:$0xff]   ;;  %v5549_v22 = vld [vmem:[%s7602_s2 + $0x9e0] ss:$16 sps:$4 sm:$0xff]   ;;  %v5552_v23 = vld [vmem:[%s7602_s2 + $0x9e8] ss:$16 sps:$4 sm:$0xff]  }
 0x174   :  { %2942 = vmatprep.subr.bf16.mxu0 %v5467_v24  ;;  %3024 = vmatprep.subr.bf16.mxu1 %v5470_v25  ;;  %v5557_v24 = vld [vmem:[%s7602_s2 + $0xa04] ss:$16 sps:$4 sm:$0xff]   ;;  %v5560_v25 = vld [vmem:[%s7602_s2 + $0xa0c] ss:$16 sps:$4 sm:$0xff]  }
 0x177   :  { %2943 = vmatpush1.bf16.msra.mxu0 %v5465_v26  ;;  %3025 = vmatpush1.bf16.msra.mxu1 %v5468_v29  ;;  %v6976_v26 = vld [vmem:[%s7604_s4 + $0x4] sm:$0xf] }
 0x178   :  { %2944 = vmatprep.subr.bf16.mxu0 %v5473_v30  ;;  %3026 = vmatprep.subr.bf16.mxu1 %v5476_v31  ;;  %v1319_v29 = vrot.slane %v6976_v26, %v6563_v28  ;;  %v1323_v30 = vrot.slane %v6976_v26, %v6571_v41  ;;  %v1331_v31 = vrot.slane %v6976_v26, %v6737_v57 }
 0x17b   :  { %2945 = vmatpush1.bf16.msra.mxu0 %v5471_v33  ;;  %3027 = vmatpush1.bf16.msra.mxu1 %v5474_v35 }
 0x17c   :  { %2946 = vmatprep.subr.bf16.mxu0 %v5479_v36  ;;  %3028 = vmatprep.subr.bf16.mxu1 %v5482_v37 }
 0x17f   :  { %2947 = vmatpush1.bf16.msra.mxu0 %v5477_v38  ;;  %3029 = vmatpush1.bf16.msra.mxu1 %v5480_v39 }
 0x180   :  { %2948 = vmatprep.subr.bf16.mxu0 %v5485_v42  ;;  %3030 = vmatprep.subr.bf16.mxu1 %v5488_v43 }
 0x183   :  { %2949 = vmatpush1.bf16.msra.mxu0 %v5483_v44  ;;  %3031 = vmatpush1.bf16.msra.mxu1 %v5486_v45 }
 0x184   :  { %2950 = vmatprep.subr.bf16.mxu0 %v5491_v46  ;;  %3032 = vmatprep.subr.bf16.mxu1 %v5494_v47 }
 0x187   :  { %2951 = vmatpush1.bf16.msra.mxu0 %v5489_v48  ;;  %3033 = vmatpush1.bf16.msra.mxu1 %v5492_v49 }
 0x188   :  { %2952 = vmatprep.subr.bf16.mxu0 %v5497_v50  ;;  %3034 = vmatprep.subr.bf16.mxu1 %v5500_v51  ;;  %v5555_v51 = vld [vmem:[%s7602_s2 + $0xa00] ss:$16 sps:$4 sm:$0xff]  }
 0x18b   :  { %2953 = vmatpush1.bf16.msra.mxu0 %v5495_v52  ;;  %3035 = vmatpush1.bf16.msra.mxu1 %v5498_v53  ;;  %v5558_v52 = vld [vmem:[%s7602_s2 + $0xa08] ss:$16 sps:$4 sm:$0xff]  }
 0x18c   :  { %2954 = vmatprep.subr.bf16.mxu0 %v5503_v54  ;;  %3036 = vmatprep.subr.bf16.mxu1 %v5506_v55  ;;  %v5563_v54 = vld [vmem:[%s7602_s2 + $0xa24] ss:$16 sps:$4 sm:$0xff]   ;;  %v5566_v55 = vld [vmem:[%s7602_s2 + $0xa2c] ss:$16 sps:$4 sm:$0xff]  }
 0x18f   :  { %2955 = vmatpush1.bf16.msra.mxu0 %v5501_v58  ;;  %3037 = vmatpush1.bf16.msra.mxu1 %v5504_v59  ;;  %v5561_v59 = vld [vmem:[%s7602_s2 + $0xa20] ss:$16 sps:$4 sm:$0xff]  }
 0x190   :  { %2956 = vmatprep.subr.bf16.mxu0 %v5509_v60  ;;  %3038 = vmatprep.subr.bf16.mxu1 %v5512_v61  ;;  %v5564_v60 = vld [vmem:[%s7602_s2 + $0xa28] ss:$16 sps:$4 sm:$0xff]   ;;  %v5569_v61 = vld [vmem:[%s7602_s2 + $0xa44] ss:$16 sps:$4 sm:$0xff]  }
 0x193   :  { %2957 = vmatpush1.bf16.msra.mxu0 %v5507_v27  ;;  %3039 = vmatpush1.bf16.msra.mxu1 %v5510_v62  ;;  %v5572_v27 = vld [vmem:[%s7602_s2 + $0xa4c] ss:$16 sps:$4 sm:$0xff]   ;;  %v5567_v62 = vld [vmem:[%s7602_s2 + $0xa40] ss:$16 sps:$4 sm:$0xff]  }
 0x194   :  { %2958 = vmatprep.subr.bf16.mxu0 %v5515_v63  ;;  %3040 = vmatprep.subr.bf16.mxu1 %v5518_v0  ;;  %v5570_v63 = vld [vmem:[%s7602_s2 + $0xa48] ss:$16 sps:$4 sm:$0xff]   ;;  %v5575_v0 = vld [vmem:[%s7602_s2 + $0xa64] ss:$16 sps:$4 sm:$0xff]  }
 0x197   :  { %2959 = vmatpush1.bf16.msra.mxu0 %v5513_v1  ;;  %3041 = vmatpush1.bf16.msra.mxu1 %v5516_v2  ;;  %v5578_v1 = vld [vmem:[%s7602_s2 + $0xa6c] ss:$16 sps:$4 sm:$0xff]   ;;  %v5573_v2 = vld [vmem:[%s7602_s2 + $0xa60] ss:$16 sps:$4 sm:$0xff]  }
 0x198   :  { %2960 = vmatprep.subr.bf16.mxu0 %v5521_v3  ;;  %3042 = vmatprep.subr.bf16.mxu1 %v5524_v4  ;;  %v5576_v3 = vld [vmem:[%s7602_s2 + $0xa68] ss:$16 sps:$4 sm:$0xff]   ;;  %v5581_v4 = vld [vmem:[%s7602_s2 + $0xa84] ss:$16 sps:$4 sm:$0xff]  }
 0x19b   :  { %2961 = vmatpush1.bf16.msra.mxu0 %v5519_v5  ;;  %3043 = vmatpush1.bf16.msra.mxu1 %v5522_v6  ;;  %v5584_v5 = vld [vmem:[%s7602_s2 + $0xa8c] ss:$16 sps:$4 sm:$0xff]   ;;  %v5579_v6 = vld [vmem:[%s7602_s2 + $0xa80] ss:$16 sps:$4 sm:$0xff]  }
 0x19c   :  { %2962 = vmatprep.subr.bf16.mxu0 %v5527_v7  ;;  %3044 = vmatprep.subr.bf16.mxu1 %v5530_v32  ;;  %v5582_v7 = vld [vmem:[%s7602_s2 + $0xa88] ss:$16 sps:$4 sm:$0xff]   ;;  %v5587_v32 = vld [vmem:[%s7602_s2 + $0xaa4] ss:$16 sps:$4 sm:$0xff]  }
 0x19f   :  { %2963 = vmatpush1.bf16.msra.mxu0 %v5525_v8  ;;  %3045 = vmatpush1.bf16.msra.mxu1 %v5528_v9  ;;  %v5590_v8 = vld [vmem:[%s7602_s2 + $0xaac] ss:$16 sps:$4 sm:$0xff]   ;;  %v5585_v9 = vld [vmem:[%s7602_s2 + $0xaa0] ss:$16 sps:$4 sm:$0xff]  }
 0x1a0   :  { %2964 = vmatprep.subr.bf16.mxu0 %v5533_v10  ;;  %3046 = vmatprep.subr.bf16.mxu1 %v5536_v34  ;;  %v5588_v10 = vld [vmem:[%s7602_s2 + $0xaa8] ss:$16 sps:$4 sm:$0xff]   ;;  %v5593_v34 = vld [vmem:[%s7602_s2 + $0xac4] ss:$16 sps:$4 sm:$0xff]  }
 0x1a3   :  { %2965 = vmatpush1.bf16.msra.mxu0 %v5531_v40  ;;  %3047 = vmatpush1.bf16.msra.mxu1 %v5534_v11  ;;  %v5596_v40 = vld [vmem:[%s7602_s2 + $0xacc] ss:$16 sps:$4 sm:$0xff]   ;;  %v5591_v11 = vld [vmem:[%s7602_s2 + $0xac0] ss:$16 sps:$4 sm:$0xff]  }
 0x1a4   :  { %2966 = vmatprep.subr.bf16.mxu0 %v5539_v12  ;;  %3048 = vmatprep.subr.bf16.mxu1 %v5542_v13  ;;  %v5594_v12 = vld [vmem:[%s7602_s2 + $0xac8] ss:$16 sps:$4 sm:$0xff]   ;;  %v5599_v13 = vld [vmem:[%s7602_s2 + $0xae4] ss:$16 sps:$4 sm:$0xff]  }
 0x1a7   :  { %2967 = vmatpush1.bf16.msra.mxu0 %v5537_v14  ;;  %3049 = vmatpush1.bf16.msra.mxu1 %v5540_v15  ;;  %v5602_v14 = vld [vmem:[%s7602_s2 + $0xaec] ss:$16 sps:$4 sm:$0xff]   ;;  %v5597_v15 = vld [vmem:[%s7602_s2 + $0xae0] ss:$16 sps:$4 sm:$0xff]  }
 0x1a8   :  { %2968 = vmatprep.subr.bf16.mxu0 %v5545_v16  ;;  %3050 = vmatprep.subr.bf16.mxu1 %v5548_v17  ;;  %v5600_v16 = vld [vmem:[%s7602_s2 + $0xae8] ss:$16 sps:$4 sm:$0xff]   ;;  %v5605_v17 = vld [vmem:[%s7602_s2 + $0xb04] ss:$16 sps:$4 sm:$0xff]  }
 0x1ab   :  { %2969 = vmatpush1.bf16.msra.mxu0 %v5543_v18  ;;  %3051 = vmatpush1.bf16.msra.mxu1 %v5546_v19  ;;  %v5608_v18 = vld [vmem:[%s7602_s2 + $0xb0c] ss:$16 sps:$4 sm:$0xff]   ;;  %v5603_v19 = vld [vmem:[%s7602_s2 + $0xb00] ss:$16 sps:$4 sm:$0xff]  }
 0x1ac   :  { %2970 = vmatprep.subr.bf16.mxu0 %v5551_v20  ;;  %3052 = vmatprep.subr.bf16.mxu1 %v5554_v21  ;;  %v5606_v20 = vld [vmem:[%s7602_s2 + $0xb08] ss:$16 sps:$4 sm:$0xff]   ;;  %v5611_v21 = vld [vmem:[%s7602_s2 + $0xb24] ss:$16 sps:$4 sm:$0xff]  }
 0x1af   :  { %2971 = vmatpush1.bf16.msra.mxu0 %v5549_v22  ;;  %3053 = vmatpush1.bf16.msra.mxu1 %v5552_v23  ;;  %v5614_v22 = vld [vmem:[%s7602_s2 + $0xb2c] ss:$16 sps:$4 sm:$0xff]   ;;  %v5609_v23 = vld [vmem:[%s7602_s2 + $0xb20] ss:$16 sps:$4 sm:$0xff]  }
 0x1b0   :  { %2981 = vmatprep.subr.bf16.mxu0 %v5557_v24  ;;  %3063 = vmatprep.subr.bf16.mxu1 %v5560_v25  ;;  %v5612_v24 = vld [vmem:[%s7602_s2 + $0xb28] ss:$16 sps:$4 sm:$0xff]   ;;  %v5617_v25 = vld [vmem:[%s7602_s2 + $0xb44] ss:$16 sps:$4 sm:$0xff]  }
 0x245   :  { %v2051_v33 = vpop.f32.mrb[12].mxu0  ;;  %v6984_v35 = vpop.f32.mrb[12].mxu1 }
 0x246   :  { %v5011_v36 = vadd.f32 %v2051_v33, %v1319_v29  ;;  %v2053_v37 = vpop.f32.mrb[13].mxu0  ;;  %v2135_v38 = vpop.f32.mrb[13].mxu1  ;;  %v5620_v29 = vld [vmem:[%s7602_s2 + $0xb4c] ss:$16 sps:$4 sm:$0xff]   ;;  %v5623_v33 = vld [vmem:[%s7602_s2 + $0xb64] ss:$16 sps:$4 sm:$0xff]  }
 0x247   :  { %v5012_v39 = vadd.f32 %v2053_v37, %v1323_v30  ;;  %v5014_v42 = vadd.f32 %v2135_v38, %v1331_v31  ;;  %v2055_v43 = vpop.f32.mrb[14].mxu0  ;;  %v2137_v44 = vpop.f32.mrb[14].mxu1  ;;  %v5615_v30 = vld [vmem:[%s7602_s2 + $0xb40] ss:$16 sps:$4 sm:$0xff]   ;;  %v5618_v31 = vld [vmem:[%s7602_s2 + $0xb48] ss:$16 sps:$4 sm:$0xff]  }
 0x248   :  { %v2140_v45 = vmax.f32 %v5011_v36, 0.0  ;;  %v2056_v46 = vpop.f32.mrb[15].mxu0  ;;  %v2138_v47 = vpop.f32.mrb[15].mxu1  ;;  %v5626_v36 = vld [vmem:[%s7602_s2 + $0xb6c] ss:$16 sps:$4 sm:$0xff]  }
 0x249   :  { %v2141_v48 = vmax.f32 %v5012_v39, 0.0  ;;  %v2143_v49 = vmax.f32 %v5014_v42, 0.0  ;;  %v5621_v37 = vld [vmem:[%s7602_s2 + $0xb60] ss:$16 sps:$4 sm:$0xff]   ;;  %v5624_v38 = vld [vmem:[%s7602_s2 + $0xb68] ss:$16 sps:$4 sm:$0xff]  }
 0x24a   :  { %v2144_v53 = vpack.c.bf16 %v2140_v45, %v2140_v45  ;;  %v5629_v39 = vld [vmem:[%s7602_s2 + $0xb84] ss:$16 sps:$4 sm:$0xff]   ;;  %v5632_v42 = vld [vmem:[%s7602_s2 + $0xb8c] ss:$16 sps:$4 sm:$0xff]   ;;  %v5627_v43 = vld [vmem:[%s7602_s2 + $0xb80] ss:$16 sps:$4 sm:$0xff]  }
 0x24b   :  { %v2145_v50 = vpack.c.bf16 %v2141_v48, %v2141_v48  ;;  %v2147_v58 = vpack.c.bf16 %v2143_v49, %v2143_v49  ;;  %v5630_v44 = vld [vmem:[%s7602_s2 + $0xb88] ss:$16 sps:$4 sm:$0xff]   ;;  %v5635_v45 = vld [vmem:[%s7602_s2 + $0xba4] ss:$16 sps:$4 sm:$0xff]   ;;  %v5638_v46 = vld [vmem:[%s7602_s2 + $0xbac] ss:$16 sps:$4 sm:$0xff]   ;;  %v1327_v49 = vrot.slane %v6976_v26, %v6734_v56 }
 0x24c   :  { %v5633_v47 = vld [vmem:[%s7602_s2 + $0xba0] ss:$16 sps:$4 sm:$0xff]   ;;  %v5636_v48 = vld [vmem:[%s7602_s2 + $0xba8] ss:$16 sps:$4 sm:$0xff]  }
 0x24d   :  { %2972 = vmatprep.mubr.bf16.mxu0 %v2145_v50  ;;  %3054 = vmatprep.mubr.bf16.mxu1 %v2145_v50  ;;  %v5641_v50 = vld [vmem:[%s7602_s2 + $0xbc4] ss:$16 sps:$4 sm:$0xff]   ;;  %v5642_v26 = vld [vmem:[%s7602_s2 + $0xbc8] ss:$16 sps:$4 sm:$0xff]  }
 0x24e   :  { %2973 = vmatmul.mubr.bf16.vlgmr.msra.gmra.mrb[16].mxu0 %v2144_v53  ;;  %3055 = vmatmul.mubr.bf16.vlgmr.msra.gmra.mrb[16].mxu1 %v2144_v53  ;;  %v5013_v53 = vadd.f32 %v6984_v35, %v1327_v49  ;;  %v5648_v35 = vld [vmem:[%s7602_s2 + $0xbe8] ss:$16 sps:$4 sm:$0xff]   ;;  %v5725_v49 = vld [vmem:[%s7602_s2 + $0xd84] ss:$16 sps:$4 sm:$0xff]  }
 0x24f   :  { %2982 = vmatpush1.bf16.msra.mxu0 %v5555_v51  ;;  %3064 = vmatpush1.bf16.msra.mxu1 %v5558_v52  ;;  %v5644_v51 = vld [vmem:[%s7602_s2 + $0xbcc] ss:$16 sps:$4 sm:$0xff]   ;;  %v5639_v52 = vld [vmem:[%s7602_s2 + $0xbc0] ss:$16 sps:$4 sm:$0xff]  }
 0x250   :  { %3013 = vmatprep.mubr.bf16.mxu0 %v2147_v58  ;;  %3095 = vmatprep.mubr.bf16.mxu1 %v2147_v58  ;;  %v5645_v58 = vld [vmem:[%s7602_s2 + $0xbe0] ss:$16 sps:$4 sm:$0xff]  }
 0x251   :  { %2983 = vmatprep.subr.bf16.mxu0 %v5563_v54  ;;  %3065 = vmatprep.subr.bf16.mxu1 %v5566_v55  ;;  %v5647_v54 = vld [vmem:[%s7602_s2 + $0xbe4] ss:$16 sps:$4 sm:$0xff]   ;;  %v5650_v55 = vld [vmem:[%s7602_s2 + $0xbec] ss:$16 sps:$4 sm:$0xff]  }
 0x253   :  { %2984 = vmatpush1.bf16.msra.mxu0 %v5561_v59  ;;  %3066 = vmatpush1.bf16.msra.mxu1 %v5564_v60  ;;  %v2142_v59 = vmax.f32 %v5013_v53, 0.0  ;;  %v5653_v60 = vld [vmem:[%s7602_s2 + $0xc04] ss:$16 sps:$4 sm:$0xff]   ;;  %v5734_v53 = vld [vmem:[%s7602_s2 + $0xdac] ss:$16 sps:$4 sm:$0xff]  }
 0x254   :  { %2985 = vmatprep.subr.bf16.mxu0 %v5569_v61  ;;  %3067 = vmatprep.subr.bf16.mxu1 %v5572_v27  ;;  %v5656_v61 = vld [vmem:[%s7602_s2 + $0xc0c] ss:$16 sps:$4 sm:$0xff]   ;;  %v5651_v27 = vld [vmem:[%s7602_s2 + $0xc00] ss:$16 sps:$4 sm:$0xff]  }
 0x257   :  { %2986 = vmatpush1.bf16.msra.mxu0 %v5567_v62  ;;  %3068 = vmatpush1.bf16.msra.mxu1 %v5570_v63  ;;  %v5654_v62 = vld [vmem:[%s7602_s2 + $0xc08] ss:$16 sps:$4 sm:$0xff]   ;;  %v2146_v63 = vpack.c.bf16 %v2142_v59, %v2142_v59  ;;  %v5735_v59 = vld [vmem:[%s7602_s2 + $0xdc0] ss:$16 sps:$4 sm:$0xff]  }
 0x258   :  { %2987 = vmatprep.subr.bf16.mxu0 %v5575_v0  ;;  %3069 = vmatprep.subr.bf16.mxu1 %v5578_v1  ;;  %v5659_v0 = vld [vmem:[%s7602_s2 + $0xc24] ss:$16 sps:$4 sm:$0xff]   ;;  %v5662_v1 = vld [vmem:[%s7602_s2 + $0xc2c] ss:$16 sps:$4 sm:$0xff]  }
 0x25b   :  { %2988 = vmatpush1.bf16.msra.mxu0 %v5573_v2  ;;  %3070 = vmatpush1.bf16.msra.mxu1 %v5576_v3  ;;  %v5657_v2 = vld [vmem:[%s7602_s2 + $0xc20] ss:$16 sps:$4 sm:$0xff]   ;;  %v5660_v3 = vld [vmem:[%s7602_s2 + $0xc28] ss:$16 sps:$4 sm:$0xff]  }
 0x25c   :  { %2989 = vmatprep.subr.bf16.mxu0 %v5581_v4  ;;  %3071 = vmatprep.subr.bf16.mxu1 %v5584_v5  ;;  %v5665_v4 = vld [vmem:[%s7602_s2 + $0xc44] ss:$16 sps:$4 sm:$0xff]   ;;  %v5668_v5 = vld [vmem:[%s7602_s2 + $0xc4c] ss:$16 sps:$4 sm:$0xff]  }
 0x25f   :  { %2990 = vmatpush1.bf16.msra.mxu0 %v5579_v6  ;;  %3072 = vmatpush1.bf16.msra.mxu1 %v5582_v7  ;;  %v5663_v6 = vld [vmem:[%s7602_s2 + $0xc40] ss:$16 sps:$4 sm:$0xff]   ;;  %v5666_v7 = vld [vmem:[%s7602_s2 + $0xc48] ss:$16 sps:$4 sm:$0xff]  }
 0x260   :  { %2991 = vmatprep.subr.bf16.mxu0 %v5587_v32  ;;  %3073 = vmatprep.subr.bf16.mxu1 %v5590_v8  ;;  %v5671_v32 = vld [vmem:[%s7602_s2 + $0xc64] ss:$16 sps:$4 sm:$0xff]   ;;  %v5674_v8 = vld [vmem:[%s7602_s2 + $0xc6c] ss:$16 sps:$4 sm:$0xff]  }
 0x263   :  { %2992 = vmatpush1.bf16.msra.mxu0 %v5585_v9  ;;  %3074 = vmatpush1.bf16.msra.mxu1 %v5588_v10  ;;  %v5669_v9 = vld [vmem:[%s7602_s2 + $0xc60] ss:$16 sps:$4 sm:$0xff]   ;;  %v5672_v10 = vld [vmem:[%s7602_s2 + $0xc68] ss:$16 sps:$4 sm:$0xff]  }
 0x264   :  { %2993 = vmatprep.subr.bf16.mxu0 %v5593_v34  ;;  %3075 = vmatprep.subr.bf16.mxu1 %v5596_v40  ;;  %v5677_v34 = vld [vmem:[%s7602_s2 + $0xc84] ss:$16 sps:$4 sm:$0xff]   ;;  %v5680_v40 = vld [vmem:[%s7602_s2 + $0xc8c] ss:$16 sps:$4 sm:$0xff]  }
 0x267   :  { %2994 = vmatpush1.bf16.msra.mxu0 %v5591_v11  ;;  %3076 = vmatpush1.bf16.msra.mxu1 %v5594_v12  ;;  %v5675_v11 = vld [vmem:[%s7602_s2 + $0xc80] ss:$16 sps:$4 sm:$0xff]   ;;  %v5678_v12 = vld [vmem:[%s7602_s2 + $0xc88] ss:$16 sps:$4 sm:$0xff]  }
 0x268   :  { %2995 = vmatprep.subr.bf16.mxu0 %v5599_v13  ;;  %3077 = vmatprep.subr.bf16.mxu1 %v5602_v14  ;;  %v5683_v13 = vld [vmem:[%s7602_s2 + $0xca4] ss:$16 sps:$4 sm:$0xff]   ;;  %v5686_v14 = vld [vmem:[%s7602_s2 + $0xcac] ss:$16 sps:$4 sm:$0xff]  }
 0x26b   :  { %2996 = vmatpush1.bf16.msra.mxu0 %v5597_v15  ;;  %3078 = vmatpush1.bf16.msra.mxu1 %v5600_v16  ;;  %v5681_v15 = vld [vmem:[%s7602_s2 + $0xca0] ss:$16 sps:$4 sm:$0xff]   ;;  %v5684_v16 = vld [vmem:[%s7602_s2 + $0xca8] ss:$16 sps:$4 sm:$0xff]  }
 0x26c   :  { %2997 = vmatprep.subr.bf16.mxu0 %v5605_v17  ;;  %3079 = vmatprep.subr.bf16.mxu1 %v5608_v18  ;;  %v5689_v17 = vld [vmem:[%s7602_s2 + $0xcc4] ss:$16 sps:$4 sm:$0xff]   ;;  %v5692_v18 = vld [vmem:[%s7602_s2 + $0xccc] ss:$16 sps:$4 sm:$0xff]  }
 0x26f   :  { %2998 = vmatpush1.bf16.msra.mxu0 %v5603_v19  ;;  %3080 = vmatpush1.bf16.msra.mxu1 %v5606_v20  ;;  %v5687_v19 = vld [vmem:[%s7602_s2 + $0xcc0] ss:$16 sps:$4 sm:$0xff]   ;;  %v5690_v20 = vld [vmem:[%s7602_s2 + $0xcc8] ss:$16 sps:$4 sm:$0xff]  }
 0x270   :  { %2999 = vmatprep.subr.bf16.mxu0 %v5611_v21  ;;  %3081 = vmatprep.subr.bf16.mxu1 %v5614_v22  ;;  %v5695_v21 = vld [vmem:[%s7602_s2 + $0xce4] ss:$16 sps:$4 sm:$0xff]   ;;  %v5698_v22 = vld [vmem:[%s7602_s2 + $0xcec] ss:$16 sps:$4 sm:$0xff]  }
 0x273   :  { %3000 = vmatpush1.bf16.msra.mxu0 %v5609_v23  ;;  %3082 = vmatpush1.bf16.msra.mxu1 %v5612_v24  ;;  %v5693_v23 = vld [vmem:[%s7602_s2 + $0xce0] ss:$16 sps:$4 sm:$0xff]   ;;  %v5696_v24 = vld [vmem:[%s7602_s2 + $0xce8] ss:$16 sps:$4 sm:$0xff]  }
 0x274   :  { %3001 = vmatprep.subr.bf16.mxu0 %v5617_v25  ;;  %3083 = vmatprep.subr.bf16.mxu1 %v5620_v29  ;;  %v5701_v25 = vld [vmem:[%s7602_s2 + $0xd04] ss:$16 sps:$4 sm:$0xff]   ;;  %v5704_v29 = vld [vmem:[%s7602_s2 + $0xd0c] ss:$16 sps:$4 sm:$0xff]  }
 0x277   :  { %3002 = vmatpush1.bf16.msra.mxu0 %v5615_v30  ;;  %3084 = vmatpush1.bf16.msra.mxu1 %v5618_v31  ;;  %v5699_v30 = vld [vmem:[%s7602_s2 + $0xd00] ss:$16 sps:$4 sm:$0xff]   ;;  %v5702_v31 = vld [vmem:[%s7602_s2 + $0xd08] ss:$16 sps:$4 sm:$0xff]  }
 0x278   :  { %3003 = vmatprep.subr.bf16.mxu0 %v5623_v33  ;;  %3085 = vmatprep.subr.bf16.mxu1 %v5626_v36  ;;  %v5707_v33 = vld [vmem:[%s7602_s2 + $0xd24] ss:$16 sps:$4 sm:$0xff]   ;;  %v5710_v36 = vld [vmem:[%s7602_s2 + $0xd2c] ss:$16 sps:$4 sm:$0xff]  }
 0x27b   :  { %3004 = vmatpush1.bf16.msra.mxu0 %v5621_v37  ;;  %3086 = vmatpush1.bf16.msra.mxu1 %v5624_v38  ;;  %v5705_v37 = vld [vmem:[%s7602_s2 + $0xd20] ss:$16 sps:$4 sm:$0xff]   ;;  %v5708_v38 = vld [vmem:[%s7602_s2 + $0xd28] ss:$16 sps:$4 sm:$0xff]  }
 0x27c   :  { %3005 = vmatprep.subr.bf16.mxu0 %v5629_v39  ;;  %3087 = vmatprep.subr.bf16.mxu1 %v5632_v42  ;;  %v5713_v39 = vld [vmem:[%s7602_s2 + $0xd44] ss:$16 sps:$4 sm:$0xff]   ;;  %v5716_v42 = vld [vmem:[%s7602_s2 + $0xd4c] ss:$16 sps:$4 sm:$0xff]  }
 0x27f   :  { %3006 = vmatpush1.bf16.msra.mxu0 %v5627_v43  ;;  %3088 = vmatpush1.bf16.msra.mxu1 %v5630_v44  ;;  %v5711_v43 = vld [vmem:[%s7602_s2 + $0xd40] ss:$16 sps:$4 sm:$0xff]   ;;  %v5714_v44 = vld [vmem:[%s7602_s2 + $0xd48] ss:$16 sps:$4 sm:$0xff]  }
 0x280   :  { %3007 = vmatprep.subr.bf16.mxu0 %v5635_v45  ;;  %3089 = vmatprep.subr.bf16.mxu1 %v5638_v46  ;;  %v5719_v45 = vld [vmem:[%s7602_s2 + $0xd64] ss:$16 sps:$4 sm:$0xff]   ;;  %v5722_v46 = vld [vmem:[%s7602_s2 + $0xd6c] ss:$16 sps:$4 sm:$0xff]  }
 0x283   :  { %3008 = vmatpush1.bf16.msra.mxu0 %v5633_v47  ;;  %3090 = vmatpush1.bf16.msra.mxu1 %v5636_v48  ;;  %v5717_v47 = vld [vmem:[%s7602_s2 + $0xd60] ss:$16 sps:$4 sm:$0xff]   ;;  %v5720_v48 = vld [vmem:[%s7602_s2 + $0xd68] ss:$16 sps:$4 sm:$0xff]  }
 0x284   :  { %3009 = vmatprep.subr.bf16.mxu0 %v5641_v50  ;;  %3091 = vmatprep.subr.bf16.mxu1 %v5644_v51  ;;  %v5728_v50 = vld [vmem:[%s7602_s2 + $0xd8c] ss:$16 sps:$4 sm:$0xff]   ;;  %v5723_v51 = vld [vmem:[%s7602_s2 + $0xd80] ss:$16 sps:$4 sm:$0xff]  }
 0x287   :  { %3010 = vmatpush1.bf16.msra.mxu0 %v5639_v52  ;;  %3092 = vmatpush1.bf16.msra.mxu1 %v5642_v26  ;;  %v5726_v52 = vld [vmem:[%s7602_s2 + $0xd88] ss:$16 sps:$4 sm:$0xff]   ;;  %v5731_v26 = vld [vmem:[%s7602_s2 + $0xda4] ss:$16 sps:$4 sm:$0xff]  }
 0x288   :  { %3011 = vmatprep.subr.bf16.mxu0 %v5647_v54  ;;  %3093 = vmatprep.subr.bf16.mxu1 %v5650_v55  ;;  %v5729_v54 = vld [vmem:[%s7602_s2 + $0xda0] ss:$16 sps:$4 sm:$0xff]   ;;  %v5732_v55 = vld [vmem:[%s7602_s2 + $0xda8] ss:$16 sps:$4 sm:$0xff]  }
 0x28b   :  { %3012 = vmatpush1.bf16.msra.mxu0 %v5645_v58  ;;  %3094 = vmatpush1.bf16.msra.mxu1 %v5648_v35  ;;  %v5737_v58 = vld [vmem:[%s7602_s2 + $0xdc4] ss:$16 sps:$4 sm:$0xff]   ;;  %v5740_v35 = vld [vmem:[%s7602_s2 + $0xdcc] ss:$16 sps:$4 sm:$0xff]  }
 0x28c   :  { %3904 = vmatprep.subr.bf16.mxu0 %v5653_v60  ;;  %3986 = vmatprep.subr.bf16.mxu1 %v5656_v61  ;;  %v5738_v60 = vld [vmem:[%s7602_s2 + $0xdc8] ss:$16 sps:$4 sm:$0xff]   ;;  %v5743_v61 = vld [vmem:[%s7602_s2 + $0xde4] ss:$16 sps:$4 sm:$0xff]  }
 0x28e   :  { %3014 = vmatmul.mubr.bf16.vlgmr.msra.gmra.mrb[16].mxu0 %v2146_v63  ;;  %3096 = vmatmul.mubr.bf16.vlgmr.msra.gmra.mrb[16].mxu1 %v2146_v63  ;;  %v5744_v63 = vld [vmem:[%s7602_s2 + $0xde8] ss:$16 sps:$4 sm:$0xff]  }
 0x28f   :  { %3905 = vmatpush1.bf16.msra.mxu0 %v5651_v27  ;;  %3987 = vmatpush1.bf16.msra.mxu1 %v5654_v62  ;;  %v5746_v27 = vld [vmem:[%s7602_s2 + $0xdec] ss:$16 sps:$4 sm:$0xff]   ;;  %v5741_v62 = vld [vmem:[%s7602_s2 + $0xde0] ss:$16 sps:$4 sm:$0xff]  }
 0x290   :  { %3906 = vmatprep.subr.bf16.mxu0 %v5659_v0  ;;  %3988 = vmatprep.subr.bf16.mxu1 %v5662_v1  ;;  %v5749_v0 = vld [vmem:[%s7602_s2 + $0xe04] ss:$16 sps:$4 sm:$0xff]   ;;  %v5752_v1 = vld [vmem:[%s7602_s2 + $0xe0c] ss:$16 sps:$4 sm:$0xff]  }
 0x293   :  { %3907 = vmatpush1.bf16.msra.mxu0 %v5657_v2  ;;  %3989 = vmatpush1.bf16.msra.mxu1 %v5660_v3  ;;  %v7376_v2 = vld [vmem:[%s7604_s4 + $0x8] sm:$0xf] }
 0x294   :  { %3908 = vmatprep.subr.bf16.mxu0 %v5665_v4  ;;  %3990 = vmatprep.subr.bf16.mxu1 %v5668_v5  ;;  %v2283_v3 = vrot.slane %v7376_v2, %v6563_v28  ;;  %v2287_v4 = vrot.slane %v7376_v2, %v6571_v41  ;;  %v2295_v5 = vrot.slane %v7376_v2, %v6737_v57 }
 0x297   :  { %3909 = vmatpush1.bf16.msra.mxu0 %v5663_v6  ;;  %3991 = vmatpush1.bf16.msra.mxu1 %v5666_v7 }
 0x298   :  { %3910 = vmatprep.subr.bf16.mxu0 %v5671_v32  ;;  %3992 = vmatprep.subr.bf16.mxu1 %v5674_v8 }
 0x29b   :  { %3911 = vmatpush1.bf16.msra.mxu0 %v5669_v9  ;;  %3993 = vmatpush1.bf16.msra.mxu1 %v5672_v10 }
 0x29c   :  { %3912 = vmatprep.subr.bf16.mxu0 %v5677_v34  ;;  %3994 = vmatprep.subr.bf16.mxu1 %v5680_v40 }
 0x29f   :  { %3913 = vmatpush1.bf16.msra.mxu0 %v5675_v11  ;;  %3995 = vmatpush1.bf16.msra.mxu1 %v5678_v12 }
 0x2a0   :  { %3914 = vmatprep.subr.bf16.mxu0 %v5683_v13  ;;  %3996 = vmatprep.subr.bf16.mxu1 %v5686_v14 }
 0x2a3   :  { %3915 = vmatpush1.bf16.msra.mxu0 %v5681_v15  ;;  %3997 = vmatpush1.bf16.msra.mxu1 %v5684_v16 }
 0x2a4   :  { %3916 = vmatprep.subr.bf16.mxu0 %v5689_v17  ;;  %3998 = vmatprep.subr.bf16.mxu1 %v5692_v18  ;;  %v5747_v18 = vld [vmem:[%s7602_s2 + $0xe00] ss:$16 sps:$4 sm:$0xff]  }
 0x2a7   :  { %3917 = vmatpush1.bf16.msra.mxu0 %v5687_v19  ;;  %3999 = vmatpush1.bf16.msra.mxu1 %v5690_v20  ;;  %v5750_v19 = vld [vmem:[%s7602_s2 + $0xe08] ss:$16 sps:$4 sm:$0xff]  }
 0x2a8   :  { %3918 = vmatprep.subr.bf16.mxu0 %v5695_v21  ;;  %4000 = vmatprep.subr.bf16.mxu1 %v5698_v22  ;;  %v5755_v21 = vld [vmem:[%s7602_s2 + $0xe24] ss:$16 sps:$4 sm:$0xff]   ;;  %v5758_v22 = vld [vmem:[%s7602_s2 + $0xe2c] ss:$16 sps:$4 sm:$0xff]  }
 0x2ab   :  { %3919 = vmatpush1.bf16.msra.mxu0 %v5693_v23  ;;  %4001 = vmatpush1.bf16.msra.mxu1 %v5696_v24  ;;  %v5753_v24 = vld [vmem:[%s7602_s2 + $0xe20] ss:$16 sps:$4 sm:$0xff]  }
 0x2ac   :  { %3920 = vmatprep.subr.bf16.mxu0 %v5701_v25  ;;  %4002 = vmatprep.subr.bf16.mxu1 %v5704_v29  ;;  %v5756_v25 = vld [vmem:[%s7602_s2 + $0xe28] ss:$16 sps:$4 sm:$0xff]   ;;  %v5761_v29 = vld [vmem:[%s7602_s2 + $0xe44] ss:$16 sps:$4 sm:$0xff]  }
 0x2af   :  { %3921 = vmatpush1.bf16.msra.mxu0 %v5699_v30  ;;  %4003 = vmatpush1.bf16.msra.mxu1 %v5702_v31  ;;  %v5764_v30 = vld [vmem:[%s7602_s2 + $0xe4c] ss:$16 sps:$4 sm:$0xff]   ;;  %v5759_v31 = vld [vmem:[%s7602_s2 + $0xe40] ss:$16 sps:$4 sm:$0xff]  }
 0x2b0   :  { %3922 = vmatprep.subr.bf16.mxu0 %v5707_v33  ;;  %4004 = vmatprep.subr.bf16.mxu1 %v5710_v36  ;;  %v5762_v33 = vld [vmem:[%s7602_s2 + $0xe48] ss:$16 sps:$4 sm:$0xff]   ;;  %v5767_v36 = vld [vmem:[%s7602_s2 + $0xe64] ss:$16 sps:$4 sm:$0xff]  }
 0x2b3   :  { %3923 = vmatpush1.bf16.msra.mxu0 %v5705_v37  ;;  %4005 = vmatpush1.bf16.msra.mxu1 %v5708_v38  ;;  %v5770_v37 = vld [vmem:[%s7602_s2 + $0xe6c] ss:$16 sps:$4 sm:$0xff]   ;;  %v5765_v38 = vld [vmem:[%s7602_s2 + $0xe60] ss:$16 sps:$4 sm:$0xff]  }
 0x2b4   :  { %3924 = vmatprep.subr.bf16.mxu0 %v5713_v39  ;;  %4006 = vmatprep.subr.bf16.mxu1 %v5716_v42  ;;  %v5768_v39 = vld [vmem:[%s7602_s2 + $0xe68] ss:$16 sps:$4 sm:$0xff]   ;;  %v5773_v42 = vld [vmem:[%s7602_s2 + $0xe84] ss:$16 sps:$4 sm:$0xff]  }
 0x2b7   :  { %3925 = vmatpush1.bf16.msra.mxu0 %v5711_v43  ;;  %4007 = vmatpush1.bf16.msra.mxu1 %v5714_v44  ;;  %v5776_v43 = vld [vmem:[%s7602_s2 + $0xe8c] ss:$16 sps:$4 sm:$0xff]   ;;  %v5771_v44 = vld [vmem:[%s7602_s2 + $0xe80] ss:$16 sps:$4 sm:$0xff]  }
 0x2b8   :  { %3926 = vmatprep.subr.bf16.mxu0 %v5719_v45  ;;  %4008 = vmatprep.subr.bf16.mxu1 %v5722_v46  ;;  %v5774_v45 = vld [vmem:[%s7602_s2 + $0xe88] ss:$16 sps:$4 sm:$0xff]   ;;  %v5779_v46 = vld [vmem:[%s7602_s2 + $0xea4] ss:$16 sps:$4 sm:$0xff]  }
 0x2bb   :  { %3927 = vmatpush1.bf16.msra.mxu0 %v5717_v47  ;;  %4009 = vmatpush1.bf16.msra.mxu1 %v5720_v48  ;;  %v5782_v47 = vld [vmem:[%s7602_s2 + $0xeac] ss:$16 sps:$4 sm:$0xff]   ;;  %v5777_v48 = vld [vmem:[%s7602_s2 + $0xea0] ss:$16 sps:$4 sm:$0xff]  }
 0x2bc   :  { %3928 = vmatprep.subr.bf16.mxu0 %v5725_v49  ;;  %4010 = vmatprep.subr.bf16.mxu1 %v5728_v50  ;;  %v5780_v49 = vld [vmem:[%s7602_s2 + $0xea8] ss:$16 sps:$4 sm:$0xff]   ;;  %v5785_v50 = vld [vmem:[%s7602_s2 + $0xec4] ss:$16 sps:$4 sm:$0xff]  }
 0x2bf   :  { %3929 = vmatpush1.bf16.msra.mxu0 %v5723_v51  ;;  %4011 = vmatpush1.bf16.msra.mxu1 %v5726_v52  ;;  %v5788_v51 = vld [vmem:[%s7602_s2 + $0xecc] ss:$16 sps:$4 sm:$0xff]   ;;  %v5783_v52 = vld [vmem:[%s7602_s2 + $0xec0] ss:$16 sps:$4 sm:$0xff]  }
 0x2c0   :  { %3930 = vmatprep.subr.bf16.mxu0 %v5731_v26  ;;  %4012 = vmatprep.subr.bf16.mxu1 %v5734_v53  ;;  %v5786_v26 = vld [vmem:[%s7602_s2 + $0xec8] ss:$16 sps:$4 sm:$0xff]   ;;  %v5791_v53 = vld [vmem:[%s7602_s2 + $0xee4] ss:$16 sps:$4 sm:$0xff]  }
 0x2c3   :  { %3931 = vmatpush1.bf16.msra.mxu0 %v5729_v54  ;;  %4013 = vmatpush1.bf16.msra.mxu1 %v5732_v55  ;;  %v5794_v54 = vld [vmem:[%s7602_s2 + $0xeec] ss:$16 sps:$4 sm:$0xff]   ;;  %v5789_v55 = vld [vmem:[%s7602_s2 + $0xee0] ss:$16 sps:$4 sm:$0xff]  }
 0x2c4   :  { %3932 = vmatprep.subr.bf16.mxu0 %v5737_v58  ;;  %4014 = vmatprep.subr.bf16.mxu1 %v5740_v35  ;;  %v5792_v58 = vld [vmem:[%s7602_s2 + $0xee8] ss:$16 sps:$4 sm:$0xff]   ;;  %v5797_v35 = vld [vmem:[%s7602_s2 + $0xf04] ss:$16 sps:$4 sm:$0xff]  }
 0x2c7   :  { %3933 = vmatpush1.bf16.msra.mxu0 %v5735_v59  ;;  %4015 = vmatpush1.bf16.msra.mxu1 %v5738_v60  ;;  %v5800_v59 = vld [vmem:[%s7602_s2 + $0xf0c] ss:$16 sps:$4 sm:$0xff]   ;;  %v5795_v60 = vld [vmem:[%s7602_s2 + $0xf00] ss:$16 sps:$4 sm:$0xff]  }
 0x2c8   :  { %3934 = vmatprep.subr.bf16.mxu0 %v5743_v61  ;;  %4016 = vmatprep.subr.bf16.mxu1 %v5746_v27  ;;  %v5798_v61 = vld [vmem:[%s7602_s2 + $0xf08] ss:$16 sps:$4 sm:$0xff]   ;;  %v5803_v27 = vld [vmem:[%s7602_s2 + $0xf24] ss:$16 sps:$4 sm:$0xff]  }
 0x2cb   :  { %3935 = vmatpush1.bf16.msra.mxu0 %v5741_v62  ;;  %4017 = vmatpush1.bf16.msra.mxu1 %v5744_v63  ;;  %v5806_v62 = vld [vmem:[%s7602_s2 + $0xf2c] ss:$16 sps:$4 sm:$0xff]   ;;  %v5801_v63 = vld [vmem:[%s7602_s2 + $0xf20] ss:$16 sps:$4 sm:$0xff]  }
 0x2cc   :  { %3945 = vmatprep.subr.bf16.mxu0 %v5749_v0  ;;  %4027 = vmatprep.subr.bf16.mxu1 %v5752_v1  ;;  %v5804_v0 = vld [vmem:[%s7602_s2 + $0xf28] ss:$16 sps:$4 sm:$0xff]   ;;  %v5809_v1 = vld [vmem:[%s7602_s2 + $0xf44] ss:$16 sps:$4 sm:$0xff]  }
 0x361   :  { %v3015_v6 = vpop.f32.mrb[16].mxu0  ;;  %v7384_v7 = vpop.f32.mrb[16].mxu1 }
 0x362   :  { %v5015_v32 = vadd.f32 %v3015_v6, %v2283_v3  ;;  %v3017_v8 = vpop.f32.mrb[17].mxu0  ;;  %v3099_v9 = vpop.f32.mrb[17].mxu1  ;;  %v5812_v3 = vld [vmem:[%s7602_s2 + $0xf4c] ss:$16 sps:$4 sm:$0xff]   ;;  %v5815_v6 = vld [vmem:[%s7602_s2 + $0xf64] ss:$16 sps:$4 sm:$0xff]  }
 0x363   :  { %v5016_v10 = vadd.f32 %v3017_v8, %v2287_v4  ;;  %v5018_v34 = vadd.f32 %v3099_v9, %v2295_v5  ;;  %v3019_v40 = vpop.f32.mrb[18].mxu0  ;;  %v3101_v11 = vpop.f32.mrb[18].mxu1  ;;  %v5807_v4 = vld [vmem:[%s7602_s2 + $0xf40] ss:$16 sps:$4 sm:$0xff]   ;;  %v5810_v5 = vld [vmem:[%s7602_s2 + $0xf48] ss:$16 sps:$4 sm:$0xff]  }
 0x364   :  { %v3104_v12 = vmax.f32 %v5015_v32, 0.0  ;;  %v3020_v13 = vpop.f32.mrb[19].mxu0  ;;  %v3102_v14 = vpop.f32.mrb[19].mxu1  ;;  %v5818_v32 = vld [vmem:[%s7602_s2 + $0xf6c] ss:$16 sps:$4 sm:$0xff]  }
 0x365   :  { %v3105_v15 = vmax.f32 %v5016_v10, 0.0  ;;  %v3107_v16 = vmax.f32 %v5018_v34, 0.0  ;;  %v5813_v8 = vld [vmem:[%s7602_s2 + $0xf60] ss:$16 sps:$4 sm:$0xff]   ;;  %v5816_v9 = vld [vmem:[%s7602_s2 + $0xf68] ss:$16 sps:$4 sm:$0xff]  }
 0x366   :  { %v3108_v20 = vpack.c.bf16 %v3104_v12, %v3104_v12  ;;  %v5821_v10 = vld [vmem:[%s7602_s2 + $0xf84] ss:$16 sps:$4 sm:$0xff]   ;;  %v5824_v34 = vld [vmem:[%s7602_s2 + $0xf8c] ss:$16 sps:$4 sm:$0xff]   ;;  %v5819_v40 = vld [vmem:[%s7602_s2 + $0xf80] ss:$16 sps:$4 sm:$0xff]  }
 0x367   :  { %v3109_v17 = vpack.c.bf16 %v3105_v15, %v3105_v15  ;;  %v3111_v23 = vpack.c.bf16 %v3107_v16, %v3107_v16  ;;  %v5822_v11 = vld [vmem:[%s7602_s2 + $0xf88] ss:$16 sps:$4 sm:$0xff]   ;;  %v5827_v12 = vld [vmem:[%s7602_s2 + $0xfa4] ss:$16 sps:$4 sm:$0xff]   ;;  %v5830_v13 = vld [vmem:[%s7602_s2 + $0xfac] ss:$16 sps:$4 sm:$0xff]   ;;  %v2291_v16 = vrot.slane %v7376_v2, %v6734_v56 }
 0x368   :  { %v5825_v14 = vld [vmem:[%s7602_s2 + $0xfa0] ss:$16 sps:$4 sm:$0xff]   ;;  %v5828_v15 = vld [vmem:[%s7602_s2 + $0xfa8] ss:$16 sps:$4 sm:$0xff]  }
 0x369   :  { %3936 = vmatprep.mubr.bf16.mxu0 %v3109_v17  ;;  %4018 = vmatprep.mubr.bf16.mxu1 %v3109_v17  ;;  %v5833_v17 = vld [vmem:[%s7602_s2 + $0xfc4] ss:$16 sps:$4 sm:$0xff]   ;;  %v5834_v2 = vld [vmem:[%s7602_s2 + $0xfc8] ss:$16 sps:$4 sm:$0xff]  }
 0x36a   :  { %3937 = vmatmul.mubr.bf16.vlgmr.msra.gmra.mrb[20].mxu0 %v3108_v20  ;;  %4019 = vmatmul.mubr.bf16.vlgmr.msra.gmra.mrb[20].mxu1 %v3108_v20  ;;  %v5017_v20 = vadd.f32 %v7384_v7, %v2291_v16  ;;  %v5840_v7 = vld [vmem:[%s7602_s2 + $0xfe8] ss:$16 sps:$4 sm:$0xff]  }
 0x36b   :  { %3946 = vmatpush1.bf16.msra.mxu0 %v5747_v18  ;;  %4028 = vmatpush1.bf16.msra.mxu1 %v5750_v19  ;;  %v5836_v18 = vld [vmem:[%s7602_s2 + $0xfcc] ss:$16 sps:$4 sm:$0xff]   ;;  %v5831_v19 = vld [vmem:[%s7602_s2 + $0xfc0] ss:$16 sps:$4 sm:$0xff]  }
 0x36c   :  { %3977 = vmatprep.mubr.bf16.mxu0 %v3111_v23  ;;  %4059 = vmatprep.mubr.bf16.mxu1 %v3111_v23  ;;  %v5837_v23 = vld [vmem:[%s7602_s2 + $0xfe0] ss:$16 sps:$4 sm:$0xff]  }
 0x36d   :  { %3947 = vmatprep.subr.bf16.mxu0 %v5755_v21  ;;  %4029 = vmatprep.subr.bf16.mxu1 %v5758_v22  ;;  %v5839_v21 = vld [vmem:[%s7602_s2 + $0xfe4] ss:$16 sps:$4 sm:$0xff]   ;;  %v5842_v22 = vld [vmem:[%s7602_s2 + $0xfec] ss:$16 sps:$4 sm:$0xff]   ;;  %s5870_s2 = smov [#allocation2]  }
 0x36f   :  { %3948 = vmatpush1.bf16.msra.mxu0 %v5753_v24  ;;  %4030 = vmatpush1.bf16.msra.mxu1 %v5756_v25  ;;  %v3106_v24 = vmax.f32 %v5017_v20, 0.0 }
 0x370   :  { %3949 = vmatprep.subr.bf16.mxu0 %v5761_v29  ;;  %4031 = vmatprep.subr.bf16.mxu1 %v5764_v30  ;;  %v4882_v29 = vld [vmem:[%s7604_s4 + $0xc] sm:$0xf]  ;;  %s4086_s4 = sshll.u32 %s5870_s2, 4  ;;  %s4087_s4 = int_to_ptr.vmem [resolvable:$true] %s4086_s4 }
 0x371   :  { %v3110_v25 = vpack.c.bf16 %v3106_v24, %v3106_v24  ;;  %v3247_v30 = vrot.slane %v4882_v29, %v6563_v28  ;;  %s5845_s14 = scalar_lea.vmem %s4087_s4, 256  ;;  %p5850_p1 = scmp.lt.s32.totalorder %s4087_s4, %s4087_s4 }
 0x372   :  { %p5846_p0 = scmp.ne.s32.totalorder %s4087_s4, %s5845_s14  ;;  %p5851_p2 = scmp.lt.s32.totalorder %s5845_s14, %s5845_s14 }
 0x373   :  { %3950 = vmatpush1.bf16.msra.mxu0 %v5759_v31  ;;  %4032 = vmatpush1.bf16.msra.mxu1 %v5762_v33  ;;  %v3255_v31 = vrot.slane %v4882_v29, %v6734_v56  ;;  %v3251_v33 = vrot.slane %v4882_v29, %v6571_v41  ;;  %v5843_v41 = vld [vmem:[%s7600_s0] sm:$0xff] }
 0x374   :  { %3951 = vmatprep.subr.bf16.mxu0 %v5767_v36  ;;  %4033 = vmatprep.subr.bf16.mxu1 %v5770_v37  ;;  %v3259_v36 = vrot.slane %v4882_v29, %v6737_v57  ;;  %p5852_p3 = por %p5851_p2, %p5850_p1 }
 0x376   :  { %p5853_p4 = pnand %p5852_p3, %p5846_p0 }
 0x377   :  { %3952 = vmatpush1.bf16.msra.mxu0 %v5765_v38  ;;  %4034 = vmatpush1.bf16.msra.mxu1 %v5768_v39 }
 0x378   :  { %3953 = vmatprep.subr.bf16.mxu0 %v5773_v42  ;;  %4035 = vmatprep.subr.bf16.mxu1 %v5776_v43 }
 0x37b   :  { %3954 = vmatpush1.bf16.msra.mxu0 %v5771_v44  ;;  %4036 = vmatpush1.bf16.msra.mxu1 %v5774_v45 }
 0x37c   :  { %3955 = vmatprep.subr.bf16.mxu0 %v5779_v46  ;;  %4037 = vmatprep.subr.bf16.mxu1 %v5782_v47 }
 0x37f   :  { %3956 = vmatpush1.bf16.msra.mxu0 %v5777_v48  ;;  %4038 = vmatpush1.bf16.msra.mxu1 %v5780_v49 }
 0x380   :  { %3957 = vmatprep.subr.bf16.mxu0 %v5785_v50  ;;  %4039 = vmatprep.subr.bf16.mxu1 %v5788_v51  ;;  %v5844_v51 = vld [vmem:[%s7600_s0 + $0x8] sm:$0xff] }
 0x383   :  { %3958 = vmatpush1.bf16.msra.mxu0 %v5783_v52  ;;  %4040 = vmatpush1.bf16.msra.mxu1 %v5786_v26 }
 0x384   :  { %3959 = vmatprep.subr.bf16.mxu0 %v5791_v53  ;;  %4041 = vmatprep.subr.bf16.mxu1 %v5794_v54 }
 0x387   :  { %3960 = vmatpush1.bf16.msra.mxu0 %v5789_v55  ;;  %4042 = vmatpush1.bf16.msra.mxu1 %v5792_v58 }
 0x388   :  { %3961 = vmatprep.subr.bf16.mxu0 %v5797_v35  ;;  %4043 = vmatprep.subr.bf16.mxu1 %v5800_v59 }
 0x38b   :  { %3962 = vmatpush1.bf16.msra.mxu0 %v5795_v60  ;;  %4044 = vmatpush1.bf16.msra.mxu1 %v5798_v61 }
 0x38c   :  { %3963 = vmatprep.subr.bf16.mxu0 %v5803_v27  ;;  %4045 = vmatprep.subr.bf16.mxu1 %v5806_v62 }
 0x38f   :  { %3964 = vmatpush1.bf16.msra.mxu0 %v5801_v63  ;;  %4046 = vmatpush1.bf16.msra.mxu1 %v5804_v0 }
 0x390   :  { %3965 = vmatprep.subr.bf16.mxu0 %v5809_v1  ;;  %4047 = vmatprep.subr.bf16.mxu1 %v5812_v3 }
 0x393   :  { %3966 = vmatpush1.bf16.msra.mxu0 %v5807_v4  ;;  %4048 = vmatpush1.bf16.msra.mxu1 %v5810_v5 }
 0x394   :  { %3967 = vmatprep.subr.bf16.mxu0 %v5815_v6  ;;  %4049 = vmatprep.subr.bf16.mxu1 %v5818_v32 }
 0x397   :  { %3968 = vmatpush1.bf16.msra.mxu0 %v5813_v8  ;;  %4050 = vmatpush1.bf16.msra.mxu1 %v5816_v9 }
 0x398   :  { %3969 = vmatprep.subr.bf16.mxu0 %v5821_v10  ;;  %4051 = vmatprep.subr.bf16.mxu1 %v5824_v34 }
 0x39b   :  { %3970 = vmatpush1.bf16.msra.mxu0 %v5819_v40  ;;  %4052 = vmatpush1.bf16.msra.mxu1 %v5822_v11 }
 0x39c   :  { %3971 = vmatprep.subr.bf16.mxu0 %v5827_v12  ;;  %4053 = vmatprep.subr.bf16.mxu1 %v5830_v13 }
 0x39f   :  { %3972 = vmatpush1.bf16.msra.mxu0 %v5825_v14  ;;  %4054 = vmatpush1.bf16.msra.mxu1 %v5828_v15 }
 0x3a0   :  { %3973 = vmatprep.subr.bf16.mxu0 %v5833_v17  ;;  %4055 = vmatprep.subr.bf16.mxu1 %v5836_v18 }
 0x3a3   :  { %3974 = vmatpush1.bf16.msra.mxu0 %v5831_v19  ;;  %4056 = vmatpush1.bf16.msra.mxu1 %v5834_v2 }
 0x3a4   :  { %3975 = vmatprep.subr.bf16.mxu0 %v5839_v21  ;;  %4057 = vmatprep.subr.bf16.mxu1 %v5842_v22 }
 0x3a7   :  { %3976 = vmatpush1.bf16.msra.mxu0 %v5837_v23  ;;  %4058 = vmatpush1.bf16.msra.mxu1 %v5840_v7 }
 0x3aa   :  { %3978 = vmatmul.mubr.bf16.vlgmr.msra.gmra.mrb[20].mxu0 %v3110_v25  ;;  %4060 = vmatmul.mubr.bf16.vlgmr.msra.gmra.mrb[20].mxu1 %v3110_v25 }
 0x47d   :  { %v3979_v37 = vpop.f32.mrb[20].mxu0  ;;  %v4061_v38 = vpop.f32.mrb[20].mxu1 }
 0x47e   :  { %v5019_v39 = vadd.f32 %v3979_v37, %v3247_v30  ;;  %v5021_v42 = vadd.f32 %v4061_v38, %v3255_v31  ;;  %v3981_v43 = vpop.f32.mrb[21].mxu0  ;;  %v4063_v44 = vpop.f32.mrb[21].mxu1 }
 0x47f   :  { %v5020_v45 = vadd.f32 %v3981_v43, %v3251_v33  ;;  %v5022_v46 = vadd.f32 %v4063_v44, %v3259_v36  ;;  %v3983_v47 = vpop.f32.mrb[22].mxu0  ;;  %v4065_v48 = vpop.f32.mrb[22].mxu1 }
 0x480   :  { %v3984_v49 = vpop.f32.mrb[23].mxu0  ;;  %v4066_v50 = vpop.f32.mrb[23].mxu1 }
 0x481   :  { %v4072_v28 = vcombine.low %v5019_v39, %v5020_v45  ;;  %v4073_v56 = vcombine.low %v5021_v42, %v5022_v46 }
 0x483   :  { %v4076_v57 = vadd.f32 %v5843_v41, %v4072_v28  ;;  %v4077_v52 = vadd.f32 %v5844_v51, %v4073_v56 }
 0x485   :  { %4078 = vst [vmem:[#allocation2] sm:$0xff] %v4076_v57  ;;  %4079 = vst [vmem:[#allocation2 + $0x8] sm:$0xff] %v4077_v52 }
 0x486   :  { %5856 = shalt.err (!%p5853_p4)
}
 0x487   :  { %s5857_s17 = scalar_lea.hbm %s7605_s5, 256 }
 0x488   :  { %p5858_p5 = scmp.ne.s32.totalorder %s7605_s5, %s5857_s17  ;;  %p5861_p6 = scmp.lt.u32.totalorder %s5857_s17, %s7605_s5 }
 0x48a   :  { %p5863_p7 = pnand %p5861_p6, %p5858_p5 }
 0x48c   :  { %5866 = shalt.err (!%p5863_p7)
}
 0x48d   :  { %4089 = dma.vmem_to_hbm [thread:$0]  %s4087_s4, 256, %s7605_s5, [#allocation3]  }
 0x48e   :  { %5867 = dma.done.wait [#allocation3], 256  }
 0x48f   :  { %5868 = vsyncadd [#allocation3], 4294967040 }
 0x490   :  { %4093 = vsyncpa [#allocation3], 1 }

</bundles_post_ra>
